<compile_context>
chip_gen: v7x
topology: tpu7x:2x2x1
jax: 0.10.0
libtpu: 0.0.40
codegen_flags: <defaults>
</compile_context>

<pallas_src>
import jax
import jax.numpy as jnp
from jax.experimental import pallas as pl
from jax.experimental.pallas import tpu as pltpu

BF16 = jnp.bfloat16


# ---------------------------------------------------------------------------
# In-kernel helper: 3x3 "same" conv on a channel-stacked (Cin*H, W) slab.
# Vertical taps are pre-folded into the weight, so only two lane rolls + border
# masks + ONE bf16 matmul remain.
# ---------------------------------------------------------------------------
def _conv3x3_stacked(act, w_ref, b_ref, mask_l_ref, mask_r_ref):
    """act        : (Cin*H, W) f32, channel ci on rows [ci*H, (ci+1)*H).
    w_ref      : (Cout*H, 3*Cin*H) bf16; column block kw = sum_kh kron(W[:,:,kh,kw],
                 eye(H, k=kh-1)) -> vertical shifts and their zero padding folded in.
    b_ref      : (Cout*H, 1) f32 (per-channel bias repeated over H).
    mask_l_ref : (1, W) f32, 1.0 where column w-1 is in range (w >= 1).
    mask_r_ref : (1, W) f32, 1.0 where column w+1 is in range (w <= W-2).
    Returns (Cout*H, W) f32."""
    _, W = act.shape
    tap_l = pltpu.roll(act, shift=1, axis=1) * mask_l_ref[...]      # in[:, w-1]
    tap_r = pltpu.roll(act, shift=W - 1, axis=1) * mask_r_ref[...]  # in[:, w+1]
    taps = jnp.concatenate(
        [tap_l.astype(BF16), act.astype(BF16), tap_r.astype(BF16)], axis=0)
    return jnp.dot(w_ref[...], taps, preferred_element_type=jnp.float32) + b_ref[...]


def _stride2_select(m, selh_ref, selw_ref):
    """Stride-2 down-selection  selh @ m @ selw  on the MXU, ~f32 exact.

    selh/selw are 0/1 matrices with exactly one nonzero per contraction, so every
    bf16 pass is exact data movement; splitting m into hi/lo bf16 parts recovers
    ~2^-16 relative precision (pure selection, no bf16 rounding of activations)."""
    hi = m.astype(BF16)
    lo = (m - hi.astype(jnp.float32)).astype(BF16)

    def sel(p):
        t = jnp.dot(p, selw_ref[...], preferred_element_type=jnp.float32)
        return jnp.dot(selh_ref[...], t.astype(BF16),
                       preferred_element_type=jnp.float32)

    return sel(hi) + sel(lo)


# ---------------------------------------------------------------------------
# Wrapper-side parameter preprocessing (weights / BN constants only).
# ---------------------------------------------------------------------------
def _fold_bn_conv(H, gamma, beta, mean, var, w, b, eps):
    """Fold eval-mode BN into per-row scale/shift columns and build the im2col
    conv weight with the vertical (kh) taps pre-summed into kron(W, shift(H,kh-1))."""
    scale = (gamma / jnp.sqrt(var + eps)).astype(jnp.float32)
    shift = (beta - mean * scale).astype(jnp.float32)
    w = w.astype(jnp.float32)
    co, ci = w.shape[0], w.shape[1]
    w_kw = []
    for kw in range(3):
        acc = jnp.zeros((co * H, ci * H), jnp.float32)
        for kh in range(3):
            acc = acc + jnp.kron(w[:, :, kh, kw],
                                 jnp.eye(H, k=kh - 1, dtype=jnp.float32))
        w_kw.append(acc)
    w_full = jnp.concatenate(w_kw, axis=1).astype(BF16)        # (Cout*H, 3*Cin*H)
    return (jnp.repeat(scale, H)[:, None],
            jnp.repeat(shift, H)[:, None],
            w_full,
            jnp.repeat(b.astype(jnp.float32), H)[:, None])


# ---------------------------------------------------------------------------
# Attention_Block forward: single fused Pallas kernel.
# ---------------------------------------------------------------------------
def attention_block(g, x, params, eps=1e-5):
    N, Cg, Hg, Wg = g.shape
    Nx, Cx, Hx, Wx = x.shape
    out_c = Cx
    assert N == Nx and Hg == 2 * Hx and Wg == 2 * Wx
    # MaxPool3d((2,2,2)) on a 4-D input also pools channel pairs, so g_pool has
    # out_c // 2 channels; the PyTorch broadcast in `g_pool + x_conv` is only
    # valid when out_c // 2 == 1, i.e. out_c == 2.
    assert out_c == 2, "Attention_Block forward only broadcasts for out_c == 2"
    assert Hx % 8 == 0, "channel-stacked slicing requires H to be a sublane multiple"

    pg = _fold_bn_conv(Hg, *params["g"], eps=eps)
    px = _fold_bn_conv(Hx, *params["x"], eps=eps)
    pc = _fold_bn_conv(Hx, *params["gc"], eps=eps)

    # Lane-dense channel-stacked layout: (N, C*H, W), W on lanes.
    g2 = g.reshape(N, Cg * Hg, Wg).astype(jnp.float32)
    x2 = x.reshape(N, Cx * Hx, Wx).astype(jnp.float32)

    # Constants hoisted out of the kernel (DMA'd once, stay VMEM resident).
    def col_masks(W):
        col = jnp.arange(W)[None, :]
        return ((col >= 1).astype(jnp.float32), (col <= W - 2).astype(jnp.float32))

    gml, gmr = col_masks(Wg)
    xml, xmr = col_masks(Wx)
    selh = (jnp.arange(Hg)[None, :] == 2 * jnp.arange(Hx)[:, None]).astype(BF16)  # (Hx, Hg)
    selw = (jnp.arange(Wg)[:, None] == 2 * jnp.arange(Wx)[None, :]).astype(BF16)  # (Wg, Wx)

    CgHg, CxHx = Cg * Hg, Cx * Hx
    OcHg, OcHx = out_c * Hg, out_c * Hx

    def kernel(g_ref, x_ref,
               gsc_ref, gsh_ref, gw_ref, gb_ref,
               xsc_ref, xsh_ref, xw_ref, xb_ref,
               csc_ref, csh_ref, cw_ref, cb_ref,
               gml_ref, gmr_ref, xml_ref, xmr_ref,
               selh_ref, selw_ref,
               out_ref):
        # ---- g branch: BN(eval) + ReLU + Conv3x3 at g resolution -------------
        g_act = jnp.maximum(g_ref[0] * gsc_ref[...] + gsh_ref[...], 0.0)
        g1 = _conv3x3_stacked(g_act, gw_ref, gb_ref, gml_ref, gmr_ref)   # (out_c*Hg, Wg)

        # ---- x branch: BN(eval) + ReLU + Conv3x3 at x resolution -------------
        x_act = jnp.maximum(x_ref[0] * xsc_ref[...] + xsh_ref[...], 0.0)
        x1 = _conv3x3_stacked(x_act, xw_ref, xb_ref, xml_ref, xmr_ref)   # (out_c*Hx, Wx)

        # ---- MaxPool3d((2,2,2)) over (channel, H, W) of g1 (out_c == 2) ------
        m = jnp.maximum(g1[0:Hg, :], g1[Hg:2 * Hg, :])                   # channel pair
        m = jnp.maximum(m, pltpu.roll(m, shift=Hg - 1, axis=0))          # rows {h, h+1}
        m = jnp.maximum(m, pltpu.roll(m, shift=Wg - 1, axis=1))          # cols {w, w+1}
        pooled = _stride2_select(m, selh_ref, selw_ref)                  # (Hx, Wx)

        # ---- gc_sum = g_pool (channel broadcast) + x_conv ---------------------
        gc_sum = x1 + jnp.concatenate([pooled] * out_c, axis=0)          # (out_c*Hx, Wx)

        # ---- gc branch: BN(eval) + ReLU + Conv3x3, then gate with raw x ------
        c_act = jnp.maximum(gc_sum * csc_ref[...] + csh_ref[...], 0.0)
        y = _conv3x3_stacked(c_act, cw_ref, cb_ref, xml_ref, xmr_ref)
        out_ref[0] = (y * x_ref[0]).astype(out_ref.dtype)

    c2 = lambda n: (0, 0)   # constant blocks: DMA'd once, stay resident across grid
    in_specs = [
        pl.BlockSpec((1, CgHg, Wg), lambda n: (n, 0, 0)),
        pl.BlockSpec((1, CxHx, Wx), lambda n: (n, 0, 0)),
        pl.BlockSpec((CgHg, 1), c2), pl.BlockSpec((CgHg, 1), c2),
        pl.BlockSpec((OcHg, 3 * CgHg), c2), pl.BlockSpec((OcHg, 1), c2),
        pl.BlockSpec((CxHx, 1), c2), pl.BlockSpec((CxHx, 1), c2),
        pl.BlockSpec((OcHx, 3 * CxHx), c2), pl.BlockSpec((OcHx, 1), c2),
        pl.BlockSpec((OcHx, 1), c2), pl.BlockSpec((OcHx, 1), c2),
        pl.BlockSpec((OcHx, 3 * OcHx), c2), pl.BlockSpec((OcHx, 1), c2),
        pl.BlockSpec((1, Wg), c2), pl.BlockSpec((1, Wg), c2),
        pl.BlockSpec((1, Wx), c2), pl.BlockSpec((1, Wx), c2),
        pl.BlockSpec((Hx, Hg), c2), pl.BlockSpec((Wg, Wx), c2),
    ]

    out = pl.pallas_call(
        kernel,
        out_shape=jax.ShapeDtypeStruct((N, OcHx, Wx), jnp.float32),
        grid=(N,),
        in_specs=in_specs,
        out_specs=pl.BlockSpec((1, OcHx, Wx), lambda n: (n, 0, 0)),
        compiler_params=pltpu.CompilerParams(
            # Batch elements are independent: with N >= 2 both of v7x's two
            # TensorCores get work; on single-TC v5e/v6e it is a short loop.
            dimension_semantics=("parallel",),
            # Resident footprint here is < 2 MiB; an explicit, modest ceiling
            # also fits v7x's smaller 64 MiB VMEM and v5e's 16 MiB default.
            vmem_limit_bytes=32 * 1024 * 1024,
        ),
    )(g2, x2, *pg, *px, *pc, gml, gmr, xml, xmr, selh, selw)
    return out.reshape(N, out_c, Hx, Wx)


# ---------------------------------------------------------------------------
# Deterministic parameter init + pure-JAX reference for verification
# ---------------------------------------------------------------------------
def init_params(key, in_c):
    c0, c1 = in_c
    out_c = c1
    keys = iter(jax.random.split(key, 32))

    def bn(c):
        return (jax.random.uniform(next(keys), (c,), jnp.float32, 0.5, 1.5),   # gamma
                jax.random.normal(next(keys), (c,), jnp.float32) * 0.1,        # beta
                jax.random.normal(next(keys), (c,), jnp.float32) * 0.1,        # running_mean
                jax.random.uniform(next(keys), (c,), jnp.float32, 0.5, 1.5))   # running_var

    def conv(ci, co):
        w = jax.random.normal(next(keys), (co, ci, 3, 3), jnp.float32) * 0.2
        b = jax.random.normal(next(keys), (co,), jnp.float32) * 0.1
        return w, b

    return {"g": bn(c0) + conv(c0, out_c),
            "x": bn(c1) + conv(c1, out_c),
            "gc": bn(c1) + conv(out_c, out_c)}


def reference(g, x, params, eps=1e-5):
    def bn_relu_conv(v, gamma, beta, mean, var, w, b):
        vn = (v - mean[None, :, None, None]) / jnp.sqrt(var[None, :, None, None] + eps)
        vn = vn * gamma[None, :, None, None] + beta[None, :, None, None]
        vn = jnp.maximum(vn, 0.0)
        out = jax.lax.conv_general_dilated(
            vn, w, (1, 1), "SAME", dimension_numbers=("NCHW", "OIHW", "NCHW"))
        return out + b[None, :, None, None]

    g1 = bn_relu_conv(g, *params["g"])
    x1 = bn_relu_conv(x, *params["x"])
    gp = jax.lax.reduce_window(g1, -jnp.inf, jax.lax.max,
                               window_dimensions=(1, 2, 2, 2),
                               window_strides=(1, 2, 2, 2), padding="VALID")
    gc = bn_relu_conv(gp + x1, *params["gc"])
    return gc * x


if __name__ == "__main__":
    in_c = (4, 2)                 # (g channels, x channels); out_c = in_c[1] = 2
    N = 2
    Hx, Wx = 8, 128               # W chosen lane-dense (full 128-lane vregs)
    Hg, Wg = 2 * Hx, 2 * Wx       # g at 2x spatial resolution so MaxPool3d matches x

    key = jax.random.PRNGKey(0)
    kg, kx, kp = jax.random.split(key, 3)
    g = jax.random.normal(kg, (N, in_c[0], Hg, Wg), jnp.float32)
    x = jax.random.normal(kx, (N, in_c[1], Hx, Wx), jnp.float32)
    params = init_params(kp, in_c)

    y = jax.block_until_ready(attention_block(g, x, params))
    y_ref = reference(g, x, params)

    assert y.shape == (N, in_c[1], Hx, Wx)
    err = float(jnp.max(jnp.abs(y - y_ref)))
    # Conv matmuls use bf16 operands (same effective precision as the XLA
    # reference's default MXU path); allow a small tolerance.
    assert jnp.allclose(y, y_ref, atol=5e-2, rtol=5e-2), f"max abs err = {err}"
    print("KERNEL_OK")
</pallas_src>

<mosaic_0001>
module attributes {stable_mosaic.version = 11 : i64} {
  func.func @kernel(%arg0: i32, %arg1: memref<1x64x256xf32, #tpu.memory_space<vmem>>, %arg2: memref<1x16x128xf32, #tpu.memory_space<vmem>>, %arg3: memref<64x1xf32, #tpu.memory_space<vmem>>, %arg4: memref<64x1xf32, #tpu.memory_space<vmem>>, %arg5: memref<32x192xbf16, #tpu.memory_space<vmem>>, %arg6: memref<32x1xf32, #tpu.memory_space<vmem>>, %arg7: memref<16x1xf32, #tpu.memory_space<vmem>>, %arg8: memref<16x1xf32, #tpu.memory_space<vmem>>, %arg9: memref<16x48xbf16, #tpu.memory_space<vmem>>, %arg10: memref<16x1xf32, #tpu.memory_space<vmem>>, %arg11: memref<16x1xf32, #tpu.memory_space<vmem>>, %arg12: memref<16x1xf32, #tpu.memory_space<vmem>>, %arg13: memref<16x48xbf16, #tpu.memory_space<vmem>>, %arg14: memref<16x1xf32, #tpu.memory_space<vmem>>, %arg15: memref<1x256xf32, #tpu.memory_space<vmem>>, %arg16: memref<1x256xf32, #tpu.memory_space<vmem>>, %arg17: memref<1x128xf32, #tpu.memory_space<vmem>>, %arg18: memref<1x128xf32, #tpu.memory_space<vmem>>, %arg19: memref<8x16xbf16, #tpu.memory_space<vmem>>, %arg20: memref<256x128xbf16, #tpu.memory_space<vmem>>, %arg21: memref<1x16x128xf32, #tpu.memory_space<vmem>>) attributes {dimension_semantics = [#tpu.dimension_semantics<parallel>], iteration_bounds = array<i64: 2>, scalar_prefetch = 0 : i64, scratch_operands = 0 : i64, tpu.core_type = #tpu.core_type<tc>, window_params = [{transform_indices = @transform_0, window_bounds = array<i64: 1, 64, 256>}, {transform_indices = @transform_1, window_bounds = array<i64: 1, 16, 128>}, {pipeline_mode = #tpu.pipeline_mode<synchronous>, transform_indices = @transform_2, window_bounds = array<i64: 64, 1>}, {pipeline_mode = #tpu.pipeline_mode<synchronous>, transform_indices = @transform_3, window_bounds = array<i64: 64, 1>}, {pipeline_mode = #tpu.pipeline_mode<synchronous>, transform_indices = @transform_4, window_bounds = array<i64: 32, 192>}, {pipeline_mode = #tpu.pipeline_mode<synchronous>, transform_indices = @transform_5, window_bounds = array<i64: 32, 1>}, {pipeline_mode = #tpu.pipeline_mode<synchronous>, transform_indices = @transform_6, window_bounds = array<i64: 16, 1>}, {pipeline_mode = #tpu.pipeline_mode<synchronous>, transform_indices = @transform_7, window_bounds = array<i64: 16, 1>}, {pipeline_mode = #tpu.pipeline_mode<synchronous>, transform_indices = @transform_8, window_bounds = array<i64: 16, 48>}, {pipeline_mode = #tpu.pipeline_mode<synchronous>, transform_indices = @transform_9, window_bounds = array<i64: 16, 1>}, {pipeline_mode = #tpu.pipeline_mode<synchronous>, transform_indices = @transform_10, window_bounds = array<i64: 16, 1>}, {pipeline_mode = #tpu.pipeline_mode<synchronous>, transform_indices = @transform_11, window_bounds = array<i64: 16, 1>}, {pipeline_mode = #tpu.pipeline_mode<synchronous>, transform_indices = @transform_12, window_bounds = array<i64: 16, 48>}, {pipeline_mode = #tpu.pipeline_mode<synchronous>, transform_indices = @transform_13, window_bounds = array<i64: 16, 1>}, {pipeline_mode = #tpu.pipeline_mode<synchronous>, transform_indices = @transform_14, window_bounds = array<i64: 1, 256>}, {pipeline_mode = #tpu.pipeline_mode<synchronous>, transform_indices = @transform_15, window_bounds = array<i64: 1, 256>}, {pipeline_mode = #tpu.pipeline_mode<synchronous>, transform_indices = @transform_16, window_bounds = array<i64: 1, 128>}, {pipeline_mode = #tpu.pipeline_mode<synchronous>, transform_indices = @transform_17, window_bounds = array<i64: 1, 128>}, {pipeline_mode = #tpu.pipeline_mode<synchronous>, transform_indices = @transform_18, window_bounds = array<i64: 8, 16>}, {pipeline_mode = #tpu.pipeline_mode<synchronous>, transform_indices = @transform_19, window_bounds = array<i64: 256, 128>}, {transform_indices = @transform_20, window_bounds = array<i64: 1, 16, 128>}]} {
    %c0 = arith.constant 0 : index
    %c0_0 = arith.constant 0 : index
    %c0_1 = arith.constant 0 : index
    %0 = vector.load %arg1[%c0, %c0_0, %c0_1] : memref<1x64x256xf32, #tpu.memory_space<vmem>>, vector<1x64x256xf32>
    %1 = vector.shape_cast %0 : vector<1x64x256xf32> to vector<64x256xf32>
    %c0_2 = arith.constant 0 : index
    %c0_3 = arith.constant 0 : index
    %2 = vector.load %arg3[%c0_2, %c0_3] : memref<64x1xf32, #tpu.memory_space<vmem>>, vector<64x1xf32>
    %3 = vector.broadcast %2 : vector<64x1xf32> to vector<64x256xf32>
    %4 = arith.mulf %1, %3 : vector<64x256xf32>
    %c0_4 = arith.constant 0 : index
    %c0_5 = arith.constant 0 : index
    %5 = vector.load %arg4[%c0_4, %c0_5] : memref<64x1xf32, #tpu.memory_space<vmem>>, vector<64x1xf32>
    %6 = vector.broadcast %5 : vector<64x1xf32> to vector<64x256xf32>
    %7 = arith.addf %4, %6 : vector<64x256xf32>
    %cst = arith.constant 0.000000e+00 : f32
    %8 = vector.broadcast %cst : f32 to vector<64x256xf32>
    %9 = arith.maximumf %7, %8 : vector<64x256xf32>
    %c1_i32 = arith.constant 1 : i32
    %10 = tpu.dynamic_rotate %9 by %c1_i32 dim 1 : vector<64x256xf32>, i32 -> vector<64x256xf32>
    %c0_6 = arith.constant 0 : index
    %c0_7 = arith.constant 0 : index
    %11 = vector.load %arg15[%c0_6, %c0_7] : memref<1x256xf32, #tpu.memory_space<vmem>>, vector<1x256xf32>
    %12 = vector.broadcast %11 : vector<1x256xf32> to vector<64x256xf32>
    %13 = arith.mulf %10, %12 : vector<64x256xf32>
    %c255_i32 = arith.constant 255 : i32
    %14 = tpu.dynamic_rotate %9 by %c255_i32 dim 1 : vector<64x256xf32>, i32 -> vector<64x256xf32>
    %c0_8 = arith.constant 0 : index
    %c0_9 = arith.constant 0 : index
    %15 = vector.load %arg16[%c0_8, %c0_9] : memref<1x256xf32, #tpu.memory_space<vmem>>, vector<1x256xf32>
    %16 = vector.broadcast %15 : vector<1x256xf32> to vector<64x256xf32>
    %17 = arith.mulf %14, %16 : vector<64x256xf32>
    %18 = arith.truncf %13 : vector<64x256xf32> to vector<64x256xbf16>
    %19 = arith.truncf %9 : vector<64x256xf32> to vector<64x256xbf16>
    %20 = arith.truncf %17 : vector<64x256xf32> to vector<64x256xbf16>
    %21 = tpu.concatenate %18, %19, %20 in 0 : vector<64x256xbf16>, vector<64x256xbf16>, vector<64x256xbf16> -> vector<192x256xbf16>
    %c0_10 = arith.constant 0 : index
    %c0_11 = arith.constant 0 : index
    %22 = vector.load %arg5[%c0_10, %c0_11] : memref<32x192xbf16, #tpu.memory_space<vmem>>, vector<32x192xbf16>
    %cst_12 = arith.constant dense<0.000000e+00> : vector<32x256xf32>
    %23 = tpu.matmul %22, %21, %cst_12 {dimension_numbers = #tpu.dot_dimension_numbers<[1], [0], [0], [1], [0, 0, 1, 1], [], []>} : vector<32x192xbf16>, vector<192x256xbf16>, vector<32x256xf32> -> vector<32x256xf32>
    %c0_13 = arith.constant 0 : index
    %c0_14 = arith.constant 0 : index
    %24 = vector.load %arg6[%c0_13, %c0_14] : memref<32x1xf32, #tpu.memory_space<vmem>>, vector<32x1xf32>
    %25 = vector.broadcast %24 : vector<32x1xf32> to vector<32x256xf32>
    %26 = arith.addf %23, %25 : vector<32x256xf32>
    %c0_15 = arith.constant 0 : index
    %c0_16 = arith.constant 0 : index
    %c0_17 = arith.constant 0 : index
    %27 = vector.load %arg2[%c0_15, %c0_16, %c0_17] : memref<1x16x128xf32, #tpu.memory_space<vmem>>, vector<1x16x128xf32>
    %28 = vector.shape_cast %27 : vector<1x16x128xf32> to vector<16x128xf32>
    %c0_18 = arith.constant 0 : index
    %c0_19 = arith.constant 0 : index
    %29 = vector.load %arg7[%c0_18, %c0_19] : memref<16x1xf32, #tpu.memory_space<vmem>>, vector<16x1xf32>
    %30 = vector.broadcast %29 : vector<16x1xf32> to vector<16x128xf32>
    %31 = arith.mulf %28, %30 : vector<16x128xf32>
    %c0_20 = arith.constant 0 : index
    %c0_21 = arith.constant 0 : index
    %32 = vector.load %arg8[%c0_20, %c0_21] : memref<16x1xf32, #tpu.memory_space<vmem>>, vector<16x1xf32>
    %33 = vector.broadcast %32 : vector<16x1xf32> to vector<16x128xf32>
    %34 = arith.addf %31, %33 : vector<16x128xf32>
    %cst_22 = arith.constant 0.000000e+00 : f32
    %35 = vector.broadcast %cst_22 : f32 to vector<16x128xf32>
    %36 = arith.maximumf %34, %35 : vector<16x128xf32>
    %c1_i32_23 = arith.constant 1 : i32
    %37 = tpu.dynamic_rotate %36 by %c1_i32_23 dim 1 : vector<16x128xf32>, i32 -> vector<16x128xf32>
    %c0_24 = arith.constant 0 : index
    %c0_25 = arith.constant 0 : index
    %38 = vector.load %arg17[%c0_24, %c0_25] : memref<1x128xf32, #tpu.memory_space<vmem>>, vector<1x128xf32>
    %39 = vector.broadcast %38 : vector<1x128xf32> to vector<16x128xf32>
    %40 = arith.mulf %37, %39 : vector<16x128xf32>
    %c127_i32 = arith.constant 127 : i32
    %41 = tpu.dynamic_rotate %36 by %c127_i32 dim 1 : vector<16x128xf32>, i32 -> vector<16x128xf32>
    %c0_26 = arith.constant 0 : index
    %c0_27 = arith.constant 0 : index
    %42 = vector.load %arg18[%c0_26, %c0_27] : memref<1x128xf32, #tpu.memory_space<vmem>>, vector<1x128xf32>
    %43 = vector.broadcast %42 : vector<1x128xf32> to vector<16x128xf32>
    %44 = arith.mulf %41, %43 : vector<16x128xf32>
    %45 = arith.truncf %40 : vector<16x128xf32> to vector<16x128xbf16>
    %46 = arith.truncf %36 : vector<16x128xf32> to vector<16x128xbf16>
    %47 = arith.truncf %44 : vector<16x128xf32> to vector<16x128xbf16>
    %48 = tpu.concatenate %45, %46, %47 in 0 : vector<16x128xbf16>, vector<16x128xbf16>, vector<16x128xbf16> -> vector<48x128xbf16>
    %c0_28 = arith.constant 0 : index
    %c0_29 = arith.constant 0 : index
    %49 = vector.load %arg9[%c0_28, %c0_29] : memref<16x48xbf16, #tpu.memory_space<vmem>>, vector<16x48xbf16>
    %cst_30 = arith.constant dense<0.000000e+00> : vector<16x128xf32>
    %50 = tpu.matmul %49, %48, %cst_30 {dimension_numbers = #tpu.dot_dimension_numbers<[1], [0], [0], [1], [0, 0, 1, 1], [], []>} : vector<16x48xbf16>, vector<48x128xbf16>, vector<16x128xf32> -> vector<16x128xf32>
    %c0_31 = arith.constant 0 : index
    %c0_32 = arith.constant 0 : index
    %51 = vector.load %arg10[%c0_31, %c0_32] : memref<16x1xf32, #tpu.memory_space<vmem>>, vector<16x1xf32>
    %52 = vector.broadcast %51 : vector<16x1xf32> to vector<16x128xf32>
    %53 = arith.addf %50, %52 : vector<16x128xf32>
    %54 = vector.extract_strided_slice %26 {offsets = [0, 0], sizes = [16, 256], strides = [1, 1]} : vector<32x256xf32> to vector<16x256xf32>
    %55 = vector.extract_strided_slice %26 {offsets = [16, 0], sizes = [16, 256], strides = [1, 1]} : vector<32x256xf32> to vector<16x256xf32>
    %56 = arith.maximumf %54, %55 : vector<16x256xf32>
    %c15_i32 = arith.constant 15 : i32
    %57 = tpu.dynamic_rotate %56 by %c15_i32 dim 0 : vector<16x256xf32>, i32 -> vector<16x256xf32>
    %58 = arith.maximumf %56, %57 : vector<16x256xf32>
    %c255_i32_33 = arith.constant 255 : i32
    %59 = tpu.dynamic_rotate %58 by %c255_i32_33 dim 1 : vector<16x256xf32>, i32 -> vector<16x256xf32>
    %60 = arith.maximumf %58, %59 : vector<16x256xf32>
    %61 = arith.truncf %60 : vector<16x256xf32> to vector<16x256xbf16>
    %62 = arith.extf %61 : vector<16x256xbf16> to vector<16x256xf32>
    %63 = arith.subf %60, %62 : vector<16x256xf32>
    %64 = arith.truncf %63 : vector<16x256xf32> to vector<16x256xbf16>
    %c0_34 = arith.constant 0 : index
    %c0_35 = arith.constant 0 : index
    %65 = vector.load %arg20[%c0_34, %c0_35] : memref<256x128xbf16, #tpu.memory_space<vmem>>, vector<256x128xbf16>
    %cst_36 = arith.constant dense<0.000000e+00> : vector<16x128xf32>
    %66 = tpu.matmul %61, %65, %cst_36 {dimension_numbers = #tpu.dot_dimension_numbers<[1], [0], [0], [1], [0, 0, 1, 1], [], []>} : vector<16x256xbf16>, vector<256x128xbf16>, vector<16x128xf32> -> vector<16x128xf32>
    %c0_37 = arith.constant 0 : index
    %c0_38 = arith.constant 0 : index
    %67 = vector.load %arg19[%c0_37, %c0_38] : memref<8x16xbf16, #tpu.memory_space<vmem>>, vector<8x16xbf16>
    %68 = arith.truncf %66 : vector<16x128xf32> to vector<16x128xbf16>
    %cst_39 = arith.constant dense<0.000000e+00> : vector<8x128xf32>
    %69 = tpu.matmul %67, %68, %cst_39 {dimension_numbers = #tpu.dot_dimension_numbers<[1], [0], [0], [1], [0, 0, 1, 1], [], []>} : vector<8x16xbf16>, vector<16x128xbf16>, vector<8x128xf32> -> vector<8x128xf32>
    %c0_40 = arith.constant 0 : index
    %c0_41 = arith.constant 0 : index
    %70 = vector.load %arg20[%c0_40, %c0_41] : memref<256x128xbf16, #tpu.memory_space<vmem>>, vector<256x128xbf16>
    %cst_42 = arith.constant dense<0.000000e+00> : vector<16x128xf32>
    %71 = tpu.matmul %64, %70, %cst_42 {dimension_numbers = #tpu.dot_dimension_numbers<[1], [0], [0], [1], [0, 0, 1, 1], [], []>} : vector<16x256xbf16>, vector<256x128xbf16>, vector<16x128xf32> -> vector<16x128xf32>
    %c0_43 = arith.constant 0 : index
    %c0_44 = arith.constant 0 : index
    %72 = vector.load %arg19[%c0_43, %c0_44] : memref<8x16xbf16, #tpu.memory_space<vmem>>, vector<8x16xbf16>
    %73 = arith.truncf %71 : vector<16x128xf32> to vector<16x128xbf16>
    %cst_45 = arith.constant dense<0.000000e+00> : vector<8x128xf32>
    %74 = tpu.matmul %72, %73, %cst_45 {dimension_numbers = #tpu.dot_dimension_numbers<[1], [0], [0], [1], [0, 0, 1, 1], [], []>} : vector<8x16xbf16>, vector<16x128xbf16>, vector<8x128xf32> -> vector<8x128xf32>
    %75 = arith.addf %69, %74 : vector<8x128xf32>
    %76 = tpu.concatenate %75, %75 in 0 : vector<8x128xf32>, vector<8x128xf32> -> vector<16x128xf32>
    %77 = arith.addf %53, %76 : vector<16x128xf32>
    %c0_46 = arith.constant 0 : index
    %c0_47 = arith.constant 0 : index
    %78 = vector.load %arg11[%c0_46, %c0_47] : memref<16x1xf32, #tpu.memory_space<vmem>>, vector<16x1xf32>
    %79 = vector.broadcast %78 : vector<16x1xf32> to vector<16x128xf32>
    %80 = arith.mulf %77, %79 : vector<16x128xf32>
    %c0_48 = arith.constant 0 : index
    %c0_49 = arith.constant 0 : index
    %81 = vector.load %arg12[%c0_48, %c0_49] : memref<16x1xf32, #tpu.memory_space<vmem>>, vector<16x1xf32>
    %82 = vector.broadcast %81 : vector<16x1xf32> to vector<16x128xf32>
    %83 = arith.addf %80, %82 : vector<16x128xf32>
    %cst_50 = arith.constant 0.000000e+00 : f32
    %84 = vector.broadcast %cst_50 : f32 to vector<16x128xf32>
    %85 = arith.maximumf %83, %84 : vector<16x128xf32>
    %c1_i32_51 = arith.constant 1 : i32
    %86 = tpu.dynamic_rotate %85 by %c1_i32_51 dim 1 : vector<16x128xf32>, i32 -> vector<16x128xf32>
    %c0_52 = arith.constant 0 : index
    %c0_53 = arith.constant 0 : index
    %87 = vector.load %arg17[%c0_52, %c0_53] : memref<1x128xf32, #tpu.memory_space<vmem>>, vector<1x128xf32>
    %88 = vector.broadcast %87 : vector<1x128xf32> to vector<16x128xf32>
    %89 = arith.mulf %86, %88 : vector<16x128xf32>
    %c127_i32_54 = arith.constant 127 : i32
    %90 = tpu.dynamic_rotate %85 by %c127_i32_54 dim 1 : vector<16x128xf32>, i32 -> vector<16x128xf32>
    %c0_55 = arith.constant 0 : index
    %c0_56 = arith.constant 0 : index
    %91 = vector.load %arg18[%c0_55, %c0_56] : memref<1x128xf32, #tpu.memory_space<vmem>>, vector<1x128xf32>
    %92 = vector.broadcast %91 : vector<1x128xf32> to vector<16x128xf32>
    %93 = arith.mulf %90, %92 : vector<16x128xf32>
    %94 = arith.truncf %89 : vector<16x128xf32> to vector<16x128xbf16>
    %95 = arith.truncf %85 : vector<16x128xf32> to vector<16x128xbf16>
    %96 = arith.truncf %93 : vector<16x128xf32> to vector<16x128xbf16>
    %97 = tpu.concatenate %94, %95, %96 in 0 : vector<16x128xbf16>, vector<16x128xbf16>, vector<16x128xbf16> -> vector<48x128xbf16>
    %c0_57 = arith.constant 0 : index
    %c0_58 = arith.constant 0 : index
    %98 = vector.load %arg13[%c0_57, %c0_58] : memref<16x48xbf16, #tpu.memory_space<vmem>>, vector<16x48xbf16>
    %cst_59 = arith.constant dense<0.000000e+00> : vector<16x128xf32>
    %99 = tpu.matmul %98, %97, %cst_59 {dimension_numbers = #tpu.dot_dimension_numbers<[1], [0], [0], [1], [0, 0, 1, 1], [], []>} : vector<16x48xbf16>, vector<48x128xbf16>, vector<16x128xf32> -> vector<16x128xf32>
    %c0_60 = arith.constant 0 : index
    %c0_61 = arith.constant 0 : index
    %100 = vector.load %arg14[%c0_60, %c0_61] : memref<16x1xf32, #tpu.memory_space<vmem>>, vector<16x1xf32>
    %101 = vector.broadcast %100 : vector<16x1xf32> to vector<16x128xf32>
    %102 = arith.addf %99, %101 : vector<16x128xf32>
    %c0_62 = arith.constant 0 : index
    %c0_63 = arith.constant 0 : index
    %c0_64 = arith.constant 0 : index
    %103 = vector.load %arg2[%c0_62, %c0_63, %c0_64] : memref<1x16x128xf32, #tpu.memory_space<vmem>>, vector<1x16x128xf32>
    %104 = vector.shape_cast %103 : vector<1x16x128xf32> to vector<16x128xf32>
    %105 = arith.mulf %102, %104 : vector<16x128xf32>
    %c0_65 = arith.constant 0 : index
    %c0_66 = arith.constant 0 : index
    %c0_67 = arith.constant 0 : index
    %106 = vector.load %arg21[%c0_65, %c0_66, %c0_67] : memref<1x16x128xf32, #tpu.memory_space<vmem>>, vector<1x16x128xf32>
    %107 = vector.shape_cast %106 : vector<1x16x128xf32> to vector<16x128xf32>
    %108 = vector.shape_cast %105 : vector<16x128xf32> to vector<1x16x128xf32>
    tpu.vector_store %arg21[%c0_65, %c0_66, %c0_67], %108 {strides = array<i32>} : memref<1x16x128xf32, #tpu.memory_space<vmem>>, vector<1x16x128xf32>,
    return
  }
  func.func @transform_0(%arg0: i32) -> (i32, i32, i32) {
    %c0_i32 = arith.constant 0 : i32
    %c0_i32_0 = arith.constant 0 : i32
    %c0_i32_1 = arith.constant 0 : i32
    return %arg0, %c0_i32, %c0_i32_0 : i32, i32, i32
  }
  func.func @transform_1(%arg0: i32) -> (i32, i32, i32) {
    %c0_i32 = arith.constant 0 : i32
    %c0_i32_0 = arith.constant 0 : i32
    %c0_i32_1 = arith.constant 0 : i32
    return %arg0, %c0_i32, %c0_i32_0 : i32, i32, i32
  }
  func.func @transform_2(%arg0: i32) -> (i32, i32) {
    %c0_i32 = arith.constant 0 : i32
    %c0_i32_0 = arith.constant 0 : i32
    %c0_i32_1 = arith.constant 0 : i32
    return %c0_i32, %c0_i32_0 : i32, i32
  }
  func.func @transform_3(%arg0: i32) -> (i32, i32) {
    %c0_i32 = arith.constant 0 : i32
    %c0_i32_0 = arith.constant 0 : i32
    %c0_i32_1 = arith.constant 0 : i32
    return %c0_i32, %c0_i32_0 : i32, i32
  }
  func.func @transform_4(%arg0: i32) -> (i32, i32) {
    %c0_i32 = arith.constant 0 : i32
    %c0_i32_0 = arith.constant 0 : i32
    %c0_i32_1 = arith.constant 0 : i32
    return %c0_i32, %c0_i32_0 : i32, i32
  }
  func.func @transform_5(%arg0: i32) -> (i32, i32) {
    %c0_i32 = arith.constant 0 : i32
    %c0_i32_0 = arith.constant 0 : i32
    %c0_i32_1 = arith.constant 0 : i32
    return %c0_i32, %c0_i32_0 : i32, i32
  }
  func.func @transform_6(%arg0: i32) -> (i32, i32) {
    %c0_i32 = arith.constant 0 : i32
    %c0_i32_0 = arith.constant 0 : i32
    %c0_i32_1 = arith.constant 0 : i32
    return %c0_i32, %c0_i32_0 : i32, i32
  }
  func.func @transform_7(%arg0: i32) -> (i32, i32) {
    %c0_i32 = arith.constant 0 : i32
    %c0_i32_0 = arith.constant 0 : i32
    %c0_i32_1 = arith.constant 0 : i32
    return %c0_i32, %c0_i32_0 : i32, i32
  }
  func.func @transform_8(%arg0: i32) -> (i32, i32) {
    %c0_i32 = arith.constant 0 : i32
    %c0_i32_0 = arith.constant 0 : i32
    %c0_i32_1 = arith.constant 0 : i32
    return %c0_i32, %c0_i32_0 : i32, i32
  }
  func.func @transform_9(%arg0: i32) -> (i32, i32) {
    %c0_i32 = arith.constant 0 : i32
    %c0_i32_0 = arith.constant 0 : i32
    %c0_i32_1 = arith.constant 0 : i32
    return %c0_i32, %c0_i32_0 : i32, i32
  }
  func.func @transform_10(%arg0: i32) -> (i32, i32) {
    %c0_i32 = arith.constant 0 : i32
    %c0_i32_0 = arith.constant 0 : i32
    %c0_i32_1 = arith.constant 0 : i32
    return %c0_i32, %c0_i32_0 : i32, i32
  }
  func.func @transform_11(%arg0: i32) -> (i32, i32) {
    %c0_i32 = arith.constant 0 : i32
    %c0_i32_0 = arith.constant 0 : i32
    %c0_i32_1 = arith.constant 0 : i32
    return %c0_i32, %c0_i32_0 : i32, i32
  }
  func.func @transform_12(%arg0: i32) -> (i32, i32) {
    %c0_i32 = arith.constant 0 : i32
    %c0_i32_0 = arith.constant 0 : i32
    %c0_i32_1 = arith.constant 0 : i32
    return %c0_i32, %c0_i32_0 : i32, i32
  }
  func.func @transform_13(%arg0: i32) -> (i32, i32) {
    %c0_i32 = arith.constant 0 : i32
    %c0_i32_0 = arith.constant 0 : i32
    %c0_i32_1 = arith.constant 0 : i32
    return %c0_i32, %c0_i32_0 : i32, i32
  }
  func.func @transform_14(%arg0: i32) -> (i32, i32) {
    %c0_i32 = arith.constant 0 : i32
    %c0_i32_0 = arith.constant 0 : i32
    %c0_i32_1 = arith.constant 0 : i32
    return %c0_i32, %c0_i32_0 : i32, i32
  }
  func.func @transform_15(%arg0: i32) -> (i32, i32) {
    %c0_i32 = arith.constant 0 : i32
    %c0_i32_0 = arith.constant 0 : i32
    %c0_i32_1 = arith.constant 0 : i32
    return %c0_i32, %c0_i32_0 : i32, i32
  }
  func.func @transform_16(%arg0: i32) -> (i32, i32) {
    %c0_i32 = arith.constant 0 : i32
    %c0_i32_0 = arith.constant 0 : i32
    %c0_i32_1 = arith.constant 0 : i32
    return %c0_i32, %c0_i32_0 : i32, i32
  }
  func.func @transform_17(%arg0: i32) -> (i32, i32) {
    %c0_i32 = arith.constant 0 : i32
    %c0_i32_0 = arith.constant 0 : i32
    %c0_i32_1 = arith.constant 0 : i32
    return %c0_i32, %c0_i32_0 : i32, i32
  }
  func.func @transform_18(%arg0: i32) -> (i32, i32) {
    %c0_i32 = arith.constant 0 : i32
    %c0_i32_0 = arith.constant 0 : i32
    %c0_i32_1 = arith.constant 0 : i32
    return %c0_i32, %c0_i32_0 : i32, i32
  }
  func.func @transform_19(%arg0: i32) -> (i32, i32) {
    %c0_i32 = arith.constant 0 : i32
    %c0_i32_0 = arith.constant 0 : i32
    %c0_i32_1 = arith.constant 0 : i32
    return %c0_i32, %c0_i32_0 : i32, i32
  }
  func.func @transform_20(%arg0: i32) -> (i32, i32, i32) {
    %c0_i32 = arith.constant 0 : i32
    %c0_i32_0 = arith.constant 0 : i32
    %c0_i32_1 = arith.constant 0 : i32
    return %arg0, %c0_i32, %c0_i32_0 : i32, i32, i32
  }
}

</mosaic_0001>

<bundles_post_ra>
// kernel: tpu_custom_call.1
= control target key start
LH: loop header
LB: loop body
LE: loop exit
PB: predicated region body
PF: predicated region fallthrough
CT: control target
= control target key end

     0   :  { %s3105_s0 = inlined_call_operand.vmem [shape: f32[2,64,256], index: 0, kind: input, shape index: {}]   ;;  %s3106_s1 = inlined_call_operand.hbm [shape: f32[2,16,128], index: 1, kind: input, shape index: {}]   ;;  %s3107_s2 = inlined_call_operand.vmem [shape: f32[64,1], index: 2, kind: input, shape index: {}]   ;;  %s3108_s3 = inlined_call_operand.vmem [shape: f32[64,1], index: 3, kind: input, shape index: {}]   ;;  %s3109_s4 = inlined_call_operand.hbm [shape: bf16[32,192], index: 4, kind: input, shape index: {}]   ;;  %s3110_s5 = inlined_call_operand.vmem [shape: f32[32,1], index: 5, kind: input, shape index: {}]   ;;  %s3111_s6 = inlined_call_operand.vmem [shape: f32[16,1], index: 6, kind: input, shape index: {}]   ;;  %s3112_s7 = inlined_call_operand.vmem [shape: f32[16,1], index: 7, kind: input, shape index: {}]   ;;  %s3113_s8 = inlined_call_operand.vmem [shape: bf16[16,48], index: 8, kind: input, shape index: {}]   ;;  %s3114_s9 = inlined_call_operand.vmem [shape: f32[16,1], index: 9, kind: input, shape index: {}]   ;;  %s3115_s10 = inlined_call_operand.vmem [shape: f32[16,1], index: 10, kind: input, shape index: {}]   ;;  %s3116_s11 = inlined_call_operand.vmem [shape: f32[16,1], index: 11, kind: input, shape index: {}]   ;;  %s3117_s12 = inlined_call_operand.vmem [shape: bf16[16,48], index: 12, kind: input, shape index: {}]   ;;  %s3118_s13 = inlined_call_operand.vmem [shape: f32[16,1], index: 13, kind: input, shape index: {}]   ;;  %s3119_s14 = inlined_call_operand.vmem [shape: f32[1,256], index: 14, kind: input, shape index: {}]   ;;  %s3120_s15 = inlined_call_operand.vmem [shape: f32[1,256], index: 15, kind: input, shape index: {}]   ;;  %s3121_s16 = inlined_call_operand.vmem [shape: f32[1,128], index: 16, kind: input, shape index: {}]   ;;  %s3122_s17 = inlined_call_operand.vmem [shape: f32[1,128], index: 17, kind: input, shape index: {}]   ;;  %s3123_s18 = inlined_call_operand.vmem [shape: bf16[8,16], index: 18, kind: input, shape index: {}]   ;;  %s3124_s19 = inlined_call_operand.hbm [shape: bf16[256,128], index: 19, kind: input, shape index: {}]   ;;  %s3125_s20 = inlined_call_operand.hbm [shape: f32[2,16,128], index: 20, kind: output, shape index: {}]  }
   0x1   :  { %3149 = sst [smem:[#allocation14_spill]] %s3105_s0 }
   0x2   :  { %3150 = sst [smem:[#allocation15_spill]] %s3106_s1 }
   0x3   :  { %3151 = sst [smem:[#allocation16_spill]] %s3107_s2 }
   0x4   :  { %3152 = sst [smem:[#allocation17_spill]] %s3108_s3 }
   0x5   :  { %3153 = sst [smem:[#allocation18_spill]] %s3109_s4 }
   0x6   :  { %3154 = sst [smem:[#allocation19_spill]] %s3110_s5 }
   0x7   :  { %3155 = sst [smem:[#allocation20_spill]] %s3115_s10 }
   0x8   :  { %3156 = sst [smem:[#allocation21_spill]] %s3116_s11 }
   0x9   :  { %3157 = sst [smem:[#allocation22_spill]] %s3117_s12 }
   0xa   :  { %3158 = sst [smem:[#allocation23_spill]] %s3118_s13 }
   0xb   :  { %3159 = sst [smem:[#allocation24_spill]] %s3123_s18 }
   0xc   :  { %3160 = sst [smem:[#allocation25_spill]] %s3124_s19 }
   0xd   :  { %3161 = sst [smem:[#allocation26_spill]] %s3125_s20 }
   0xe   :  { %25 = vsyncpa [#allocation3], 0 }
   0xf   :  { %27 = vsyncpa [#allocation3 + $0x1], 0 }
  0x10   :  { %28 = vsyncpa [#allocation6], 0 }
  0x11   :  { %29 = vsyncpa [#allocation4], 0 }
  0x12   :  { %31 = vsyncpa [#allocation4 + $0x1], 0  ;;  %s2372_s1 = smov 0   ;;  %s2374_s22 = smov 0  }
  0x13   :  { %s2376_s23 = smov 0   ;;  %s2378_s24 = smov 0  }
  0x14 LB: > { %3162 = sst [smem:[#allocation12_spill]] %s2238_s1  ;;  %s2393_s2 = sadd.s32 4294967295, %s2250_s24   ;;  %s2250_s24 = sphi %s2378_s24, %s3201_s24   ;;  %s2246_s23 = sphi %s2376_s23, %s3200_s23   ;;  %s2242_s22 = sphi %s2374_s22, %s3199_s22   ;;  %s2238_s1 = sphi %s2372_s1, %s3198_s1  }
  0x15   : > { %s1845_s25 = sadd.s32 4294967294, %s2250_s24   ;;  %p83_p0 = scmp.ne.s32.totalorder %s2242_s22, %s2238_s1 }
  0x16   : > { %p3134_p1 = scmp.eq.s32.totalorder %s2393_s2, 0  ;;  %p491_p3 = scmp.eq.s32.totalorder %s1845_s25, 1 }
  0x17   : > { %p1846_p5 = scmp.ge.s32.totalorder %s2250_s24, 1  ;;  %p498_p7 = scmp.lt.s32.totalorder %s2250_s24, 3 }
  0x18   : > { %p2402_p4 = por %p3134_p1, %p83_p0  ;;  %p2407_p6 = por %p491_p3, %p83_p0 }
  0x19   : > { %p2412_p8 = pnand %p1846_p5, %p498_p7  ;;  %s2252_s28 = smov [#allocation5]  }
  0x1a   : > { %s3163_s3 = scalar_select %p2402_p4, 1, 0 }
  0x1b   : > { %s3164_s26 = scalar_select %p2407_p6, 1, 0 }
  0x1c   : > { %s516_s4 = sshll.u32 %s2252_s28, 4  ;;  %p2002_p9 = pneg %p2412_p8  ;;  %s2416_s4 = int_to_ptr.vmem [resolvable:$true] %s516_s4 }
  0x1d   : > { %3165 = sst [smem:[#allocation13_spill]] %s3164_s26  ;;  %s2253_s30 = smov [#allocation7]  }
  0x1e   : > { %p2423_p11 = pnand %p2002_p9, %p3134_p1  ;;  %s571_s0 = sshll.u32 %s2253_s30, 4  ;;  %s2427_s0 = int_to_ptr.vmem [resolvable:$true] %s571_s0 }
  0x1f   : > { %s3168_s26 = sld [smem:[#allocation18_spill]] }
  0x20   : > { %p2096_p13 = pneg %p2423_p11 }
  0x25   : > { %s2094_s28 = scalar_lea.hbm %s3168_s26, 512 }
  0x26   : > { %p2095_p12 = scmp.ne.s32.totalorder %s3168_s26, %s2094_s28  ;;  %p2101_p5 = scmp.lt.u32.totalorder %s2094_s28, %s3168_s26 }
  0x28   : > { %p2097_p0 = pnand %p2096_p13, %p2095_p12 }
  0x2a   : > { %p2098_p3 = pneg %p2097_p0 }
  0x2c   : > { %p2103_p7 = pnand %p2101_p5, %p2098_p3 }
  0x2e   : > { %2106 = shalt.err (!%p2103_p7)
}
  0x2f   : > { %s2107_s30 = scalar_lea.vmem %s2416_s4, 512  ;;  %p2115_p2 = scmp.lt.s32.totalorder %s2416_s4, %s2416_s4 }
  0x30   : > { %p2108_p9 = scmp.ne.s32.totalorder %s2416_s4, %s2107_s30  ;;  %p2116_p12 = scmp.lt.s32.totalorder %s2107_s30, %s2107_s30 }
  0x32   : > { %p2110_p10 = pnand %p2108_p9, %p2096_p13  ;;  %p2117_p0 = por %p2116_p12, %p2115_p2 }
  0x34   : > { %p2111_p1 = pneg %p2110_p10 }
  0x36   : > { %p2118_p6 = pnand %p2117_p0, %p2111_p1 }
  0x38   : > { %2121 = shalt.err (!%p2118_p6)
}
  0x39   : > { %s3137_s12 = smov 128   ;;  %s3138_s13 = smov 8  }
  0x3a   : > { %2005 = dma.hbm_to_vmem [thread:$0]  (!%p2423_p11), %s3168_s26, 512, %s2416_s4, [#allocation6], %s3137_s12, %s3137_s12, %s3138_s13  }
  0x3b   : > { %s3169_s19 = sld [smem:[#allocation25_spill]] }
  0x41   : > { %s2122_s28 = scalar_lea.hbm %s3169_s19, 2048 }
  0x42   : > { %p2123_p1 = scmp.ne.s32.totalorder %s3169_s19, %s2122_s28  ;;  %p2129_p10 = scmp.lt.u32.totalorder %s2122_s28, %s3169_s19 }
  0x44   : > { %p2125_p2 = pnand %p2123_p1, %p2096_p13 }
  0x46   : > { %p2126_p6 = pneg %p2125_p2 }
  0x48   : > { %p2131_p3 = pnand %p2129_p10, %p2126_p6 }
  0x4a   : > { %2134 = shalt.err (!%p2131_p3)
}
  0x4b   : > { %s2135_s4 = scalar_lea.vmem %s2427_s0, 2048  ;;  %p2143_p12 = scmp.lt.s32.totalorder %s2427_s0, %s2427_s0 }
  0x4c   : > { %p2136_p5 = scmp.ne.s32.totalorder %s2427_s0, %s2135_s4  ;;  %p2144_p0 = scmp.lt.s32.totalorder %s2135_s4, %s2135_s4 }
  0x4e   : > { %p2138_p7 = pnand %p2136_p5, %p2096_p13  ;;  %p2145_p1 = por %p2144_p0, %p2143_p12 }
  0x50   : > { %p2139_p9 = pneg %p2138_p7 }
  0x52   : > { %p2146_p2 = pnand %p2145_p1, %p2139_p9 }
  0x54   : > { %2149 = shalt.err (!%p2146_p2)
}
  0x55   : > { %s2256_s10 = smov 64   ;;  %s2257_s11 = smov 4  }
  0x56   : > { %2008 = dma.hbm_to_vmem [thread:$0]  (!%p2423_p11), %s3169_s19, 2048, %s2427_s0, [#allocation6], %s2256_s10, %s2256_s10, %s2257_s11  }
  0x57   : > { %s2485_s1 = sadd.s32 1, %s2250_s24   ;;  %s70_s25 = sadd.s32 1, %s2246_s23 }
  0x58   : > { %s67_s21 = ssub.s32 %s2250_s24, %s2485_s1  ;;  %p77_p6 = scmp.ne.s32.totalorder %s2246_s23, %s2242_s22 }
  0x59   : > { %p68_p13 = scmp.eq.s32.totalorder %s67_s21, 0  ;;  %p78_p10 = scmp.eq.s32.totalorder %s2250_s24, 0 }
  0x5a   : > { %p3170_p5 = scmp.eq.s32.totalorder %s2393_s2, 1  ;;  %p2019_p9 = scmp.lt.s32.totalorder %s2250_s24, 2 }
  0x5b   : > { %s2494_s28 = scalar_select %p68_p13, %s2246_s23, %s70_s25  }
  0x5c   : > { %p79_p3 = por %p78_p10, %p77_p6  ;;  %p2498_p7 = por %p3170_p5, %p77_p6 }
  0x5d   : > { %s593_s29 = sand.u32 1, %s2246_s23   ;;  %s1895_s0 = sshll.u32 %s2250_s24, 8 }
  0x5e   : > { %s3171_s30 = scalar_select %p2498_p7, 1, 0 }
  0x5f   : > { %s1850_s4 = sshll.u32 %s593_s29, 4  ;;  %s3172_s18 = sld [smem:[#allocation15_spill]] }
  0x60   : > { %s597_s21 = scalar_lea.vmem [#allocation2], %s1850_s4  ;;  %p2512_p11 = pnand %p2019_p9, %p79_p3 }
  0x61   : > { %s604_s25 = sshll.u32 %s597_s21, 4  ;;  %s2516_s13 = scalar_lea.sflag [#allocation3], %s593_s29  ;;  %s2510_s25 = int_to_ptr.vmem [resolvable:$true] %s604_s25 }
  0x62   : > { %p2152_p0 = pneg %p2512_p11 }
  0x65   : > { %s2508_s20 = scalar_lea.hbm %s3172_s18, %s1895_s0  ;;  %s2155_s10 = scalar_lea.hbm %s3172_s18, 512 }
  0x66   : > { %s2150_s19 = scalar_lea.hbm %s2508_s20, 256  ;;  %p2156_p13 = scmp.lt.u32.totalorder %s2508_s20, %s3172_s18 }
  0x67   : > { %p2151_p12 = scmp.ne.s32.totalorder %s2508_s20, %s2150_s19  ;;  %p2157_p6 = scmp.lt.u32.totalorder %s2155_s10, %s2150_s19 }
  0x68   : > { %p2159_p3 = scmp.lt.u32.totalorder %s2150_s19, %s2508_s20 }
  0x69   : > { %p2153_p1 = pnand %p2152_p0, %p2151_p12  ;;  %p2158_p10 = por %p2157_p6, %p2156_p13 }
  0x6b   : > { %p2154_p2 = pneg %p2153_p1  ;;  %p2160_p5 = por %p2159_p3, %p2158_p10 }
  0x6d   : > { %p2161_p9 = pnand %p2160_p5, %p2154_p2 }
  0x6f   : > { %2164 = shalt.err (!%p2161_p9)
}
  0x70   : > { %s2165_s29 = scalar_lea.vmem %s2510_s25, 256  ;;  %s2258_s4 = smov [#allocation2]  }
  0x71   : > { %p2166_p12 = scmp.ne.s32.totalorder %s2510_s25, %s2165_s29  ;;  %s2170_s0 = sshll.u32 %s2258_s4, 4  ;;  %s2171_s0 = int_to_ptr.vmem [resolvable:$false] %s2170_s0 }
  0x72   : > { %s2172_s11 = scalar_lea.vmem %s2171_s0, 512  ;;  %p2173_p4 = scmp.lt.s32.totalorder %s2510_s25, %s2171_s0 }
  0x73   : > { %p2168_p1 = pnand %p2166_p12, %p2152_p0  ;;  %p2174_p13 = scmp.lt.s32.totalorder %s2172_s11, %s2165_s29 }
  0x75   : > { %p2169_p7 = pneg %p2168_p1  ;;  %p2175_p6 = por %p2174_p13, %p2173_p4 }
  0x77   : > { %p2176_p10 = pnand %p2175_p6, %p2169_p7 }
  0x79   : > { %2179 = shalt.err (!%p2176_p10)
}
  0x7a   : > { %s3174_s19 = smov 8   ;;  %s3175_s10 = smov 128  }
  0x7b   : > { %2012 = dma.hbm_to_vmem [thread:$0]  (!%p2512_p11), %s2508_s20, 256, %s2510_s25, %s2516_s13, %s3175_s10, %s3175_s10, %s3174_s19  }
  0x7c   : > { %616 = sbr.rel (%p2412_p8) target bundleno = 1670 (0x686), region = 100  ;;  %s2550_s21 = sand.u32 (!%p2412_p8), 1, %s2242_s22  }
  0x7d   : > { %s3141_s29 = sshll.u32 (!%p2412_p8), %s2550_s21, 4  ;;  %s619_s4 = scalar_lea.sflag (!%p2412_p8), [#allocation3], %s2550_s21 }
  0x7e   : > { %s2556_s12 = scalar_lea.vmem (!%p2412_p8), [#allocation2], %s3141_s29  ;;  %p3176_p4 = scmp.ne.s32.totalorder (!%p2412_p8), %s3163_s3, 0 }
  0x83   : > { %2225 = dma.done.wait (%p3176_p4), %s619_s4, 256  }
  0x84   : > { %2227 = vsyncadd (%p3176_p4), %s619_s4, 4294967040  ;;  %p3177_p7 = scmp.eq.s32.totalorder %s2393_s2, 0 }
  0x86   : > { %2229 = dma.done.wait (%p3177_p7), [#allocation6], 2560   ;;  %p3178_p8 = pmov %p3177_p7 }
  0x87   : > { %v2259_v0 = vmov 0   ;;  %s3179_s20 = sld [smem:[#allocation17_spill]]  ;;  %s3180_s11 = sld [smem:[#allocation16_spill]]  ;;  %vm1084_vm0 = vcmask 523264   ;;  %vm2263_vm3 = vmmov 0   ;;  %vm1224_vm4 = vcmask 392192  }
  0x88   : > { %2231 = vsyncadd (%p3178_p8), [#allocation6], 4294964736  ;;  %2069 = vset.pattern.permute.xlu1 %v2259_v0  ;;  %2068 = vset.pattern.permute.xlu0 %v2259_v0  ;;  %p692_p11 = scmp.lt.s32.totalorder %s2393_s2, 1  ;;  %s3181_s26 = sld [smem:[#allocation14_spill]]  ;;  %vm1529_vm6 = vcmask 130048  }
  0x89   : > { %s3144_s4 = smov 127   ;;  %s3182_s5 = sld [smem:[#allocation19_spill]] }
  0x8a   : > { %s693_s25 = scalar_select %p692_p11, %s2393_s2, 1 }
  0x8b   : > { %s3184_s27 = sld [smem:[#allocation20_spill]]  ;;  %s3186_s19 = sld [smem:[#allocation24_spill]] }
  0x8c   : > { %s1896_s0 = sshll.u32 %s693_s25, 7  ;;  %s3188_s13 = sld [smem:[#allocation23_spill]] }
  0x8d   : > { %v778_v1 = vld [vmem:[%s3179_s20] sm:$0xff]  ;;  %v779_v3 = vld [vmem:[%s3179_s20 + $0x8] sm:$0xff]  ;;  %v717_v5 = vld [vmem:[%s3180_s11 + $0x18] sm:$0xff]  ;;  %s1897_s18 = sshll.u32 %s2393_s2, 8  ;;  %s1728_s2 = scalar_lea.sflag [#allocation4], %s2550_s21 }
  0x8e   : > { %v714_v2 = vld [vmem:[%s3180_s11] sm:$0xff]  ;;  %788 = vperm.xlu1 %2069, %v778_v1   ;;  %v715_v4 = vld [vmem:[%s3180_s11 + $0x8] sm:$0xff]  ;;  %v716_v6 = vld [vmem:[%s3180_s11 + $0x10] sm:$0xff]  ;;  %s2619_s10 = scalar_lea.vmem %s3181_s26, %s1896_s0  ;;  %s3146_s26 = smov 1  }
  0x8f   : > { %724 = vperm.xlu0 %2068, %v714_v2   ;;  %v781_v7 = vld [vmem:[%s3179_s20 + $0x18] sm:$0xff]  ;;  %v780_v8 = vld [vmem:[%s3179_s20 + $0x10] sm:$0xff]  ;;  %v719_v9 = vld [vmem:[%s3180_s11 + $0x28] sm:$0xff]  ;;  %s3191_s0 = sld [smem:[#allocation26_spill]]  ;;  %p3192_p2 = scmp.ne.s32.totalorder %s3171_s30, 0 }
  0x90   : > { %v718_v10 = vld [vmem:[%s3180_s11 + $0x20] sm:$0xff]  ;;  %v783_v11 = vld [vmem:[%s3179_s20 + $0x28] sm:$0xff]  ;;  %v721_v13 = vld [vmem:[%s3180_s11 + $0x38] sm:$0xff] }
  0x91   : > { %v782_v12 = vld [vmem:[%s3179_s20 + $0x20] sm:$0xff]  ;;  %v720_v14 = vld [vmem:[%s3180_s11 + $0x30] sm:$0xff]  ;;  %v785_v15 = vld [vmem:[%s3179_s20 + $0x38] sm:$0xff] }
  0x92   : > { %793 = vperm.xlu1 %2069, %v779_v3   ;;  %v784_v16 = vld [vmem:[%s3179_s20 + $0x30] sm:$0xff]  ;;  %v698_v17 = vld [vmem:[%s2619_s10] sm:$0xff]  ;;  %v699_v18 = vld [vmem:[%s2619_s10 + $0x8] sm:$0xff] }
  0x93   : > { %729 = vperm.xlu0 %2068, %v715_v4   ;;  %v700_v23 = vld [vmem:[%s2619_s10 + $0x10] sm:$0xff]  ;;  %v701_v24 = vld [vmem:[%s2619_s10 + $0x18] sm:$0xff]  ;;  %v702_v38 = vld [vmem:[%s2619_s10 + $0x20] sm:$0xff] }
  0x94   : > { %v704_v34 = vld [vmem:[%s2619_s10 + $0x30] sm:$0xff]  ;;  %v705_v36 = vld [vmem:[%s2619_s10 + $0x38] sm:$0xff]  ;;  %v703_v39 = vld [vmem:[%s2619_s10 + $0x28] sm:$0xff] }
  0x95   : > { %v708_v59 = vld [vmem:[%s2619_s10 + $0x50] sm:$0xff]  ;;  %v709_v61 = vld [vmem:[%s2619_s10 + $0x58] sm:$0xff]  ;;  %v706_v63 = vld [vmem:[%s2619_s10 + $0x40] sm:$0xff] }
  0x96   : > { %739 = vperm.xlu1 %2069, %v717_v5   ;;  %v707_v0 = vld [vmem:[%s2619_s10 + $0x48] sm:$0xff] }
  0x97   : > { %734 = vperm.xlu0 %2068, %v716_v6  }
  0x9a   : > { %803 = vperm.xlu1 %2069, %v781_v7  }
  0x9b   : > { %798 = vperm.xlu0 %2068, %v780_v8  }
  0x9e   : > { %749 = vperm.xlu1 %2069, %v719_v9  }
  0x9f   : > { %744 = vperm.xlu0 %2068, %v718_v10  }
  0xa2   : > { %813 = vperm.xlu1 %2069, %v783_v11  }
  0xa3   : > { %808 = vperm.xlu0 %2068, %v782_v12  }
  0xa6   : > { %759 = vperm.xlu1 %2069, %v721_v13  }
  0xa7   : > { %754 = vperm.xlu0 %2068, %v720_v14  }
  0xaa   : > { %823 = vperm.xlu1 %2069, %v785_v15  }
  0xab   : > { %818 = vperm.xlu0 %2068, %v784_v16  }
 0x10d   : > { %v789_v19 = vpop.permute.xlu1 %788 }
 0x10e   : > { %v725_v20 = vpop.permute.xlu0 %724 }
 0x10f   : > { %v762_v21 = vmul.f32 %v725_v20, %v698_v17  ;;  %v763_v22 = vmul.f32 %v725_v20, %v699_v18  ;;  %v712_v17 = vld [vmem:[%s2619_s10 + $0x70] sm:$0xff] }
 0x111   : > { %v826_v25 = vadd.f32 %v789_v19, %v762_v21  ;;  %v794_v26 = vpop.permute.xlu1 %793  ;;  %v827_v28 = vadd.f32 %v789_v19, %v763_v22  ;;  %v713_v19 = vld [vmem:[%s2619_s10 + $0x78] sm:$0xff]  ;;  %v710_v21 = vld [vmem:[%s2619_s10 + $0x60] sm:$0xff]  ;;  %v711_v22 = vld [vmem:[%s2619_s10 + $0x68] sm:$0xff]  ;;  %s3187_s10 = smov 1  }
 0x112   : > { %v730_v27 = vpop.permute.xlu0 %729 }
 0x113   : > { %v764_v29 = vmul.f32 %v730_v27, %v700_v23  ;;  %v765_v30 = vmul.f32 %v730_v27, %v701_v24  ;;  %v2625_v31 = vmax.f32 %v826_v25, 0.0  ;;  %v2633_v40 = vmax.f32 %v827_v28, 0.0 }
 0x115   : > { %v828_v32 = vadd.f32 %v794_v26, %v764_v29  ;;  %v829_v33 = vadd.f32 %v794_v26, %v765_v30  ;;  %858 = vrot.lane.b32.xlu0 %v2625_v31, %s3146_s26  ;;  %v740_v35 = vpop.permute.xlu1 %739 }
 0x116   : > { %v735_v37 = vpop.permute.xlu0 %734  ;;  %v768_v43 = vmul.f32 %v740_v35, %v704_v34  ;;  %v769_v44 = vmul.f32 %v740_v35, %v705_v36 }
 0x117   : > { %v2635_v41 = vmax.f32 %v828_v32, 0.0  ;;  %v2637_v42 = vmax.f32 %v829_v33, 0.0  ;;  %v766_v45 = vmul.f32 %v735_v37, %v702_v38  ;;  %v767_v46 = vmul.f32 %v735_v37, %v703_v39 }
 0x119   : > { %874 = vrot.lane.b32.xlu0 %v2633_v40, %s3146_s26  ;;  %860 = vrot.lane.b32.xlu1 %v2635_v41, %s3146_s26  ;;  %v804_v47 = vpop.permute.xlu1 %803  ;;  %v1023_v49 = vpack.c.bf16 %v2637_v42, %v2633_v40  ;;  %v1022_v50 = vpack.c.bf16 %v2635_v41, %v2625_v31 }
 0x11a   : > { %v799_v48 = vpop.permute.xlu0 %798  ;;  %v832_v51 = vadd.f32 %v804_v47, %v768_v43  ;;  %v833_v52 = vadd.f32 %v804_v47, %v769_v44  ;;  %v1147_v47 = vld [vmem:[%s3111_s6 + $0x8] sm:$0xff] }
 0x11b   : > { %v830_v53 = vadd.f32 %v799_v48, %v766_v45  ;;  %v831_v54 = vadd.f32 %v799_v48, %v767_v46  ;;  %v2072_v45 = vld [vmem:[#allocation5 + $0x4] ss:$8 sps:$4 sm:$0xff]  }
 0x11c   : > { %v2647_v55 = vmax.f32 %v832_v51, 0.0  ;;  %v2649_v56 = vmax.f32 %v833_v52, 0.0  ;;  %1864 = vmatprep.mubr.msk.bf16.mxu0 %vm1084_vm0, %v2072_v45  ;;  %v1146_v46 = vld [vmem:[%s3111_s6] sm:$0xff]  ;;  %v1161_v51 = vld [vmem:[%s3112_s7 + $0x8] sm:$0xff] }
 0x11d   : > { %v2651_v57 = vmax.f32 %v830_v53, 0.0  ;;  %v2653_v58 = vmax.f32 %v831_v54, 0.0  ;;  %876 = vrot.lane.b32.xlu1 %v2637_v42, %s3146_s26  ;;  %v750_v60 = vpop.permute.xlu1 %749  ;;  %v1160_v48 = vld [vmem:[%s3112_s7] sm:$0xff]  ;;  %v1043_v53 = vld [vmem:[%s3182_s5 + $0x8] sm:$0xff]  ;;  %v1044_v54 = vld [vmem:[%s3182_s5 + $0x10] sm:$0xff] }
 0x11e   : > { %v745_v62 = vpop.permute.xlu0 %744  ;;  %v772_v3 = vmul.f32 %v750_v60, %v708_v59  ;;  %v773_v4 = vmul.f32 %v750_v60, %v709_v61  ;;  %v1042_v52 = vld [vmem:[%s3182_s5] sm:$0xff]  ;;  %v1045_v59 = vld [vmem:[%s3182_s5 + $0x18] sm:$0xff]  ;;  %v890_v60 = vlaneseq  ;;  %s3189_s5 = sld [smem:[#allocation22_spill]] }
 0x11f   : > { %862 = vrot.lane.b32.xlu0 %v2651_v57, %s3146_s26  ;;  %v1025_v1 = vpack.c.bf16 %v2649_v56, %v2653_v58  ;;  %v1024_v2 = vpack.c.bf16 %v2647_v55, %v2651_v57  ;;  %v770_v5 = vmul.f32 %v745_v62, %v706_v63  ;;  %v771_v6 = vmul.f32 %v745_v62, %v707_v0 }
 0x120   : > { %v2774_v61 = vshrl.u32 %v890_v60, 7  ;;  %v2776_v63 = vand.u32 127, %v890_v60 }
 0x121   : > { %864 = vrot.lane.b32.xlu1 %v2647_v55, %s3146_s26  ;;  %v814_v7 = vpop.permute.xlu1 %813 }
 0x122   : > { %v809_v8 = vpop.permute.xlu0 %808  ;;  %v836_v9 = vadd.f32 %v814_v7, %v772_v3  ;;  %v837_v10 = vadd.f32 %v814_v7, %v773_v4  ;;  %v913_v0 = vsub.s32 0, %v2774_v61  ;;  %v917_v3 = vsub.s32 1, %v2774_v61  ;;  %v909_v4 = vld [vmem:[%s3119_s14] sm:$0x3] }
 0x123   : > { %v834_v11 = vadd.f32 %v809_v8, %v770_v5  ;;  %v835_v12 = vadd.f32 %v809_v8, %v771_v6  ;;  %878 = vrot.lane.b32.xlu0 %v2653_v58, %s3146_s26  ;;  %vm892_vm1 = vcmp.lt.s32.totalorder %v2776_v63, 1  ;;  %vm969_vm2 = vcmp.lt.s32.totalorder %v2776_v63, 127 }
 0x124   : > { %v2671_v13 = vmax.f32 %v836_v9, 0.0  ;;  %v2673_v14 = vmax.f32 %v837_v10, 0.0  ;;  %v914_v7 = vrot.slane %v909_v4, %v913_v0  ;;  %v918_v8 = vrot.slane %v909_v4, %v917_v3 }
 0x125   : > { %v2675_v15 = vmax.f32 %v834_v11, 0.0  ;;  %v2677_v16 = vmax.f32 %v835_v12, 0.0  ;;  %880 = vrot.lane.b32.xlu1 %v2649_v56, %s3146_s26  ;;  %v760_v18 = vpop.permute.xlu1 %759  ;;  %vm1279_vm5 = vcmp.lt.s32.totalorder %v2774_v61, 7  ;;  %v1208_v61 = vld [vmem:[%s3114_s9 + $0x8] sm:$0xff] }
 0x126   : > { %v755_v20 = vpop.permute.xlu0 %754  ;;  %v776_v25 = vmul.f32 %v760_v18, %v712_v17  ;;  %v777_v26 = vmul.f32 %v760_v18, %v713_v19 }
 0x127   : > { %866 = vrot.lane.b32.xlu0 %v2675_v15, %s3146_s26  ;;  %v1027_v23 = vpack.c.bf16 %v2673_v14, %v2677_v16  ;;  %v1026_v24 = vpack.c.bf16 %v2671_v13, %v2675_v15  ;;  %v774_v27 = vmul.f32 %v755_v20, %v710_v21  ;;  %v775_v28 = vmul.f32 %v755_v20, %v711_v22 }
 0x129   : > { %868 = vrot.lane.b32.xlu1 %v2671_v13, %s3146_s26  ;;  %v824_v29 = vpop.permute.xlu1 %823 }
 0x12a   : > { %v819_v30 = vpop.permute.xlu0 %818  ;;  %v840_v32 = vadd.f32 %v824_v29, %v776_v25  ;;  %v841_v33 = vadd.f32 %v824_v29, %v777_v26 }
 0x12b   : > { %v838_v34 = vadd.f32 %v819_v30, %v774_v27  ;;  %v839_v35 = vadd.f32 %v819_v30, %v775_v28  ;;  %882 = vrot.lane.b32.xlu0 %v2677_v16, %s3146_s26 }
 0x12c   : > { %v2695_v36 = vmax.f32 %v840_v32, 0.0  ;;  %v2697_v37 = vmax.f32 %v841_v33, 0.0 }
 0x12d   : > { %v2699_v38 = vmax.f32 %v838_v34, 0.0  ;;  %v2701_v39 = vmax.f32 %v839_v35, 0.0  ;;  %884 = vrot.lane.b32.xlu1 %v2673_v14, %s3146_s26 }
 0x12f   : > { %870 = vrot.lane.b32.xlu0 %v2699_v38, %s3146_s26  ;;  %v1029_v43 = vpack.c.bf16 %v2697_v37, %v2701_v39  ;;  %v1028_v44 = vpack.c.bf16 %v2695_v36, %v2699_v38 }
 0x131   : > { %872 = vrot.lane.b32.xlu1 %v2695_v36, %s3146_s26 }
 0x133   : > { %886 = vrot.lane.b32.xlu0 %v2701_v39, %s3146_s26 }
 0x135   : > { %888 = vrot.lane.b32.xlu1 %v2697_v37, %s3146_s26 }
 0x137   : > { %937 = vrot.lane.b32.xlu0 %v2625_v31, %s3144_s4 }
 0x139   : > { %939 = vrot.lane.b32.xlu1 %v2635_v41, %s3144_s4 }
 0x13b   : > { %953 = vrot.lane.b32.xlu0 %v2633_v40, %s3144_s4 }
 0x13d   : > { %955 = vrot.lane.b32.xlu1 %v2637_v42, %s3144_s4 }
 0x13f   : > { %941 = vrot.lane.b32.xlu0 %v2651_v57, %s3144_s4 }
 0x141   : > { %943 = vrot.lane.b32.xlu1 %v2647_v55, %s3144_s4 }
 0x143   : > { %957 = vrot.lane.b32.xlu0 %v2653_v58, %s3144_s4 }
 0x145   : > { %959 = vrot.lane.b32.xlu1 %v2649_v56, %s3144_s4 }
 0x147   : > { %945 = vrot.lane.b32.xlu0 %v2675_v15, %s3144_s4 }
 0x149   : > { %947 = vrot.lane.b32.xlu1 %v2671_v13, %s3144_s4 }
 0x14b   : > { %961 = vrot.lane.b32.xlu0 %v2677_v16, %s3144_s4 }
 0x14d   : > { %963 = vrot.lane.b32.xlu1 %v2673_v14, %s3144_s4 }
 0x14f   : > { %949 = vrot.lane.b32.xlu0 %v2699_v38, %s3144_s4 }
 0x151   : > { %951 = vrot.lane.b32.xlu1 %v2695_v36, %s3144_s4 }
 0x153   : > { %965 = vrot.lane.b32.xlu0 %v2701_v39, %s3144_s4 }
 0x155   : > { %967 = vrot.lane.b32.xlu1 %v2697_v37, %s3144_s4  ;;  %s3185_s4 = sld [smem:[#allocation21_spill]] }
 0x157   : > { %1150 = vperm.xlu0 %2068, %v1146_v46  }
 0x159   : > { %1155 = vperm.xlu1 %2069, %v1147_v47  }
 0x15b   : > { %1164 = vperm.xlu0 %2068, %v1160_v48  }
 0x15d   : > { %1169 = vperm.xlu1 %2069, %v1161_v51  }
 0x15f   : > { %1048 = vperm.xlu0 %2068, %v1042_v52  }
 0x161   : > { %1053 = vperm.xlu1 %2069, %v1043_v53  }
 0x163   : > { %1058 = vperm.xlu0 %2068, %v1044_v54  }
 0x165   : > { %1063 = vperm.xlu1 %2069, %v1045_v59  }
 0x187   : > { %v859_v62 = vpop.permute.xlu0 %858 }
 0x18b   : > { %v861_v5 = vpop.permute.xlu1 %860  ;;  %v875_v6 = vpop.permute.xlu0 %874 }
 0x18c   : > { %v893_v9 = vsel %vm892_vm1, %v859_v62, %v875_v6  ;;  %v901_v10 = vsel %vm892_vm1, %v875_v6, %v859_v62 }
 0x18d   : > { %v921_v19 = vmul.f32 %v914_v7, %v901_v10  ;;  %v922_v21 = vmul.f32 %v918_v8, %v893_v9 }
 0x18f   : > { %v877_v11 = vpop.permute.xlu1 %876 }
 0x190   : > { %v894_v12 = vsel %vm892_vm1, %v861_v5, %v877_v11  ;;  %v902_v17 = vsel %vm892_vm1, %v877_v11, %v861_v5 }
 0x191   : > { %v863_v18 = vpop.permute.xlu0 %862  ;;  %v923_v20 = vmul.f32 %v914_v7, %v902_v17  ;;  %v924_v22 = vmul.f32 %v918_v8, %v894_v12 }
 0x193   : > { %v865_v25 = vpop.permute.xlu1 %864  ;;  %v1015_v26 = vpack.c.bf16 %v924_v22, %v922_v21  ;;  %v1014_v27 = vpack.c.bf16 %v923_v20, %v921_v19 }
 0x195   : > { %v879_v28 = vpop.permute.xlu0 %878  ;;  %1091 = vmatprep.subr.bf16.mxu0 %v1015_v26 }
 0x196   : > { %v895_v29 = vsel %vm892_vm1, %v863_v18, %v879_v28  ;;  %v903_v30 = vsel %vm892_vm1, %v879_v28, %v863_v18  ;;  %1092 = vmatpush1.bf16.msra.mxu0 %v1014_v27 }
 0x197   : > { %v881_v32 = vpop.permute.xlu1 %880  ;;  %v925_v45 = vmul.f32 %v914_v7, %v903_v30  ;;  %v926_v46 = vmul.f32 %v918_v8, %v895_v29 }
 0x198   : > { %v896_v33 = vsel %vm892_vm1, %v865_v25, %v881_v32  ;;  %v904_v34 = vsel %vm892_vm1, %v881_v32, %v865_v25 }
 0x199   : > { %v867_v35 = vpop.permute.xlu0 %866  ;;  %v927_v47 = vmul.f32 %v914_v7, %v904_v34  ;;  %v928_v48 = vmul.f32 %v918_v8, %v896_v33 }
 0x19b   : > { %v869_v51 = vpop.permute.xlu1 %868  ;;  %v1017_v52 = vpack.c.bf16 %v928_v48, %v926_v46  ;;  %v1016_v53 = vpack.c.bf16 %v927_v47, %v925_v45 }
 0x19d   : > { %v883_v54 = vpop.permute.xlu0 %882  ;;  %1093 = vmatprep.subr.bf16.mxu0 %v1017_v52 }
 0x19e   : > { %v897_v59 = vsel %vm892_vm1, %v867_v35, %v883_v54  ;;  %v905_v60 = vsel %vm892_vm1, %v883_v54, %v867_v35  ;;  %1094 = vmatpush1.bf16.msra.mxu0 %v1016_v53 }
 0x19f   : > { %v885_v62 = vpop.permute.xlu1 %884  ;;  %v929_v9 = vmul.f32 %v914_v7, %v905_v60  ;;  %v930_v10 = vmul.f32 %v918_v8, %v897_v59 }
 0x1a0   : > { %v898_v4 = vsel %vm892_vm1, %v869_v51, %v885_v62  ;;  %v906_v5 = vsel %vm892_vm1, %v885_v62, %v869_v51 }
 0x1a1   : > { %v871_v6 = vpop.permute.xlu0 %870  ;;  %v931_v11 = vmul.f32 %v914_v7, %v906_v5  ;;  %v932_v12 = vmul.f32 %v918_v8, %v898_v4 }
 0x1a3   : > { %v873_v17 = vpop.permute.xlu1 %872  ;;  %v1019_v18 = vpack.c.bf16 %v932_v12, %v930_v10  ;;  %v1018_v19 = vpack.c.bf16 %v931_v11, %v929_v9 }
 0x1a5   : > { %v887_v20 = vpop.permute.xlu0 %886  ;;  %1095 = vmatprep.subr.bf16.mxu0 %v1019_v18 }
 0x1a6   : > { %v899_v21 = vsel %vm892_vm1, %v871_v6, %v887_v20  ;;  %v907_v22 = vsel %vm892_vm1, %v887_v20, %v871_v6  ;;  %1096 = vmatpush1.bf16.msra.mxu0 %v1018_v19 }
 0x1a7   : > { %v889_v25 = vpop.permute.xlu1 %888  ;;  %v933_v29 = vmul.f32 %v914_v7, %v907_v22  ;;  %v934_v30 = vmul.f32 %v918_v8, %v899_v21 }
 0x1a8   : > { %v900_v26 = vsel %vm892_vm1, %v873_v17, %v889_v25  ;;  %v908_v27 = vsel %vm892_vm1, %v889_v25, %v873_v17 }
 0x1a9   : > { %v938_v28 = vpop.permute.xlu0 %937  ;;  %v935_v32 = vmul.f32 %v914_v7, %v908_v27  ;;  %v936_v33 = vmul.f32 %v918_v8, %v900_v26  ;;  %v986_v7 = vld [vmem:[%s3120_s15] sm:$0x3] }
 0x1aa   : > { %v995_v31 = vrot.slane %v986_v7, %v917_v3  ;;  %v991_v55 = vrot.slane %v986_v7, %v913_v0 }
 0x1ab   : > { %v940_v34 = vpop.permute.xlu1 %939  ;;  %v1021_v35 = vpack.c.bf16 %v936_v33, %v934_v30  ;;  %v1020_v45 = vpack.c.bf16 %v935_v32, %v933_v29  ;;  %v2070_v32 = vld [vmem:[#allocation5] ss:$8 sps:$4 sm:$0xff]   ;;  %v2073_v33 = vld [vmem:[#allocation5 + $0x14] ss:$8 sps:$4 sm:$0xff]  }
 0x1ad   : > { %v954_v46 = vpop.permute.xlu0 %953  ;;  %1097 = vmatprep.subr.bf16.mxu0 %v1021_v35 }
 0x1ae   : > { %1098 = vmatpush1.bf16.msra.mxu0 %v1020_v45  ;;  %v978_v42 = vsel %vm969_vm2, %v954_v46, %v938_v28  ;;  %v970_v58 = vsel %vm969_vm2, %v938_v28, %v954_v46  ;;  %v2075_v45 = vld [vmem:[#allocation5 + $0x10] ss:$8 sps:$4 sm:$0xff]   ;;  %v2262_v46 = vmov 0.0  }
 0x1af   : > { %v956_v47 = vpop.permute.xlu1 %955  ;;  %1099 = vmatprep.subr.bf16.mxu0 %v1023_v49  ;;  %v998_v15 = vmul.f32 %v991_v55, %v970_v58  ;;  %1954 = vmatprep.subr.bf16.mxu1 %v2262_v46 }
 0x1b0   : > { %v979_v40 = vsel %vm969_vm2, %v956_v47, %v940_v34  ;;  %1960 = vmatprep.mubr.msk.bf16.mxu1 %vm2263_vm3, %v2262_v46 }
 0x1b1   : > { %v942_v48 = vpop.permute.xlu0 %941  ;;  %v1001_v56 = vmul.f32 %v995_v31, %v979_v40 }
 0x1b2   : > { %1100 = vmatpush1.bf16.msra.mxu0 %v1022_v50  ;;  %v971_v50 = vsel %vm969_vm2, %v940_v34, %v956_v47  ;;  %v2886_v34 = vld [vmem:[%s2556_s12] sm:$0xff] }
 0x1b3   : > { %v944_v51 = vpop.permute.xlu1 %943  ;;  %1101 = vmatprep.subr.bf16.mxu0 %v1025_v1  ;;  %v999_v1 = vmul.f32 %v995_v31, %v978_v42  ;;  %v1000_v14 = vmul.f32 %v991_v55, %v971_v50 }
 0x1b5   : > { %v958_v8 = vpop.permute.xlu0 %957  ;;  %v1031_v13 = vpack.c.bf16 %v1001_v56, %v999_v1  ;;  %v1030_v59 = vpack.c.bf16 %v1000_v14, %v998_v15  ;;  %v2910_v1 = vld [vmem:[%s3121_s16] ss:$0 sm:$0xff] }
 0x1b6   : > { %1102 = vmatpush1.bf16.msra.mxu0 %v1024_v2  ;;  %v980_v16 = vsel %vm969_vm2, %v958_v8, %v942_v48 }
 0x1b7   : > { %v960_v41 = vpop.permute.xlu1 %959  ;;  %1103 = vmatprep.subr.bf16.mxu0 %v1027_v23  ;;  %v1003_v37 = vmul.f32 %v995_v31, %v980_v16 }
 0x1b8   : > { %v981_v57 = vsel %vm969_vm2, %v960_v41, %v944_v51  ;;  %v973_v0 = vsel %vm969_vm2, %v944_v51, %v960_v41 }
 0x1b9   : > { %v946_v49 = vpop.permute.xlu0 %945  ;;  %v1005_v3 = vmul.f32 %v995_v31, %v981_v57 }
 0x1ba   : > { %1104 = vmatpush1.bf16.msra.mxu0 %v1026_v24  ;;  %v972_v24 = vsel %vm969_vm2, %v942_v48, %v958_v8  ;;  %v2892_v48 = vld [vmem:[%s2556_s12 + $0x8] sm:$0xff]  ;;  %s3183_s12 = smov 127  }
 0x1bb   : > { %v948_v2 = vpop.permute.xlu1 %947  ;;  %1105 = vmatprep.subr.bf16.mxu0 %v1029_v43  ;;  %v1004_v43 = vmul.f32 %v991_v55, %v973_v0  ;;  %v1033_v38 = vpack.c.bf16 %v1005_v3, %v1003_v37 }
 0x1bd   : > { %v962_v23 = vpop.permute.xlu0 %961 }
 0x1be   : > { %1106 = vmatpush1.bf16.msra.mxu0 %v1028_v44  ;;  %v982_v52 = vsel %vm969_vm2, %v962_v23, %v946_v49  ;;  %v1002_v44 = vmul.f32 %v991_v55, %v972_v24  ;;  %v974_v62 = vsel %vm969_vm2, %v946_v49, %v962_v23 }
 0x1bf   : > { %v964_v39 = vpop.permute.xlu1 %963  ;;  %1107 = vmatprep.subr.bf16.mxu0 %v1031_v13  ;;  %v1007_v4 = vmul.f32 %v995_v31, %v982_v52  ;;  %v1006_v12 = vmul.f32 %v991_v55, %v974_v62  ;;  %v2917_v13 = vld [vmem:[%s3122_s17] ss:$0 sm:$0xff] }
 0x1c0   : > { %v983_v53 = vsel %vm969_vm2, %v964_v39, %v948_v2  ;;  %v975_v60 = vsel %vm969_vm2, %v948_v2, %v964_v39  ;;  %v1032_v10 = vpack.c.bf16 %v1004_v43, %v1002_v44  ;;  %v2077_v39 = vld [vmem:[#allocation7 + $0x40] sm:$0xff]   ;;  %v2944_v44 = vld [vmem:[#allocation7 + $0x18] sm:$0xff]  }
 0x1c1   : > { %v950_v54 = vpop.permute.xlu0 %949  ;;  %v1009_v36 = vmul.f32 %v995_v31, %v983_v53  ;;  %v1008_v6 = vmul.f32 %v991_v55, %v975_v60  ;;  %v2076_v52 = vld [vmem:[%s3113_s8] sm:$0xff]   ;;  %v2935_v60 = vld [vmem:[#allocation7 + $0x50] sm:$0xff]  }
 0x1c2   : > { %1108 = vmatpush1.bf16.msra.mxu0 %v1030_v59  ;;  %v2926_v53 = vld [vmem:[#allocation7] sm:$0xff]   ;;  %v2932_v59 = vld [vmem:[#allocation7 + $0x8] sm:$0xff]  }
 0x1c3   : > { %v952_v5 = vpop.permute.xlu1 %951  ;;  %1109 = vmatprep.subr.bf16.mxu0 %v1033_v38  ;;  %v1035_v11 = vpack.c.bf16 %v1009_v36, %v1007_v4  ;;  %v1034_v22 = vpack.c.bf16 %v1008_v6, %v1006_v12  ;;  %v2938_v36 = vld [vmem:[#allocation7 + $0x10] sm:$0xff]   ;;  %v2941_v38 = vld [vmem:[#allocation7 + $0x58] sm:$0xff]   ;;  %v2947_v62 = vld [vmem:[#allocation7 + $0x60] sm:$0xff]  }
 0x1c4   : > { %v2950_v4 = vld [vmem:[#allocation7 + $0x20] sm:$0xff]   ;;  %v2956_v6 = vld [vmem:[#allocation7 + $0x28] sm:$0xff]  }
 0x1c5   : > { %v966_v9 = vpop.permute.xlu0 %965 }
 0x1c6   : > { %v976_v17 = vsel %vm969_vm2, %v950_v54, %v966_v9  ;;  %v984_v18 = vsel %vm969_vm2, %v966_v9, %v950_v54  ;;  %1110 = vmatpush1.bf16.msra.mxu0 %v1032_v10  ;;  %v2928_v54 = vld [vmem:[#allocation7 + $0x48] sm:$0xff]  }
 0x1c7   : > { %v968_v19 = vpop.permute.xlu1 %967  ;;  %1111 = vmatprep.subr.bf16.mxu0 %v1035_v11  ;;  %v1010_v25 = vmul.f32 %v991_v55, %v976_v17  ;;  %v1011_v26 = vmul.f32 %v995_v31, %v984_v18  ;;  %v2960_v17 = vld [vmem:[#allocation7 + $0x70] sm:$0xff]  }
 0x1c8   : > { %v977_v20 = vsel %vm969_vm2, %v952_v5, %v968_v19  ;;  %v985_v21 = vsel %vm969_vm2, %v968_v19, %v952_v5  ;;  %v2953_v5 = vld [vmem:[#allocation7 + $0x68] sm:$0xff]   ;;  %v2962_v18 = vld [vmem:[#allocation7 + $0x30] sm:$0xff]  }
 0x1c9   : > { %v1012_v27 = vmul.f32 %v991_v55, %v977_v20  ;;  %v1013_v28 = vmul.f32 %v995_v31, %v985_v21 }
 0x1ca   : > { %1112 = vmatpush1.bf16.msra.mxu0 %v1034_v22 }
 0x1cb   : > { %v1037_v29 = vpack.c.bf16 %v1013_v28, %v1011_v26  ;;  %v1036_v30 = vpack.c.bf16 %v1012_v27, %v1010_v25  ;;  %v2966_v28 = vld [vmem:[#allocation7 + $0x78] sm:$0xff]  }
 0x1cd   : > { %1113 = vmatprep.subr.bf16.mxu0 %v1037_v29 }
 0x1ce   : > { %1114 = vmatpush1.bf16.msra.mxu0 %v1036_v30 }
 0x1cf   : > { %1964 = vmatprep.subr.bf16.mxu0 %v2262_v46 }
 0x1d1   : > { %1124 = vmatmul.mubr.bf16.vlgmr.msra.gmra.mrb[0].mxu0 %v2070_v32 }
 0x1d2   : > { %1865 = vmatprep.mubr.msk.bf16.mxu0 %vm1084_vm0, %v2073_v33 }
 0x1d6   : > { %v1151_v35 = vpop.permute.xlu0 %1150 }
 0x1d7   : > { %v1158_v47 = vmul.f32 %v1151_v35, %v2886_v34  ;;  %v2970_v35 = vld [vmem:[#allocation7 + $0x38] sm:$0xff]  }
 0x1d8   : > { %v1156_v51 = vpop.permute.xlu1 %1155 }
 0x1d9   : > { %1134 = vmatmul.mubr.bf16.gmra.mrb[4].mxu0 %v2075_v45  ;;  %v1159_v40 = vmul.f32 %v1156_v51, %v2892_v48 }
 0x1da   : > { %v1165_v7 = vpop.permute.xlu0 %1164  ;;  %1966 = vmatprep.mubr.msk.bf16.mxu0 %vm2263_vm3, %v2262_v46 }
 0x1db   : > { %v1172_v8 = vadd.f32 %v1165_v7, %v1158_v47 }
 0x1dc   : > { %v1170_v41 = vpop.permute.xlu1 %1169 }
 0x1dd   : > { %v1174_v31 = vmax.f32 %v1172_v8, 0.0  ;;  %v1173_v42 = vadd.f32 %v1170_v41, %v1159_v40 }
 0x1de   : > { %v1049_v56 = vpop.permute.xlu0 %1048 }
 0x1df   : > { %1176 = vrot.lane.b32.xlu0 %v1174_v31, %s3146_s26  ;;  %v1175_v49 = vmax.f32 %v1173_v42, 0.0 }
 0x1e0   : > { %v2903_v55 = vpop.permute.xlu1 %1053 }
 0x1e1   : > { %1178 = vrot.lane.b32.xlu1 %v1175_v49, %s3146_s26  ;;  %v1203_v50 = vpack.c.bf16 %v1175_v49, %v1174_v31  ;;  %s3190_s26 = sshll.u32 %s2550_s21, 4 }
 0x1e2   : > { %v1059_v57 = vpop.permute.xlu0 %1058 }
 0x1e3   : > { %1189 = vrot.lane.b32.xlu0 %v1174_v31, %s3183_s12 }
 0x1e4   : > { %v2905_v58 = vpop.permute.xlu1 %1063 }
 0x1e5   : > { %1191 = vrot.lane.b32.xlu1 %v1175_v49, %s3183_s12 }
 0x251   : > { %v1177_v2 = vpop.permute.xlu0 %1176 }
 0x252   : > { %v1187_v16 = vmul.f32 %v2910_v1, %v1177_v2 }
 0x253   : > { %v1179_v14 = vpop.permute.xlu1 %1178 }
 0x254   : > { %v1188_v23 = vmul.f32 %v2910_v1, %v1179_v14 }
 0x255   : > { %v1190_v15 = vpop.permute.xlu0 %1189 }
 0x256   : > { %v1202_v0 = vpack.c.bf16 %v1188_v23, %v1187_v16  ;;  %v1200_v37 = vmul.f32 %v2917_v13, %v1190_v15  ;;  %v1207_v16 = vld [vmem:[%s3114_s9] sm:$0xff]  ;;  %v1616_v23 = vld [vmem:[%s3184_s27 + $0x8] sm:$0xff] }
 0x257   : > { %v1192_v3 = vpop.permute.xlu1 %1191  ;;  %v1629_v15 = vld [vmem:[%s3185_s4] sm:$0xff] }
 0x258   : > { %1955 = vmatpush3.bf16.msra.mxu1 %v1202_v0  ;;  %v1201_v24 = vmul.f32 %v2917_v13, %v1192_v3  ;;  %v1615_v0 = vld [vmem:[%s3184_s27] sm:$0xff]  ;;  %v1630_v3 = vld [vmem:[%s3185_s4 + $0x8] sm:$0xff] }
 0x259   : > { %1956 = vmatprep.subr.bf16.mxu1 %v2262_v46 }
 0x25a   : > { %v1204_v43 = vpack.c.bf16 %v1201_v24, %v1200_v37 }
 0x25c   : > { %1957 = vmatpush3.bf16.msra.mxu1 %v1203_v50 }
 0x25d   : > { %1958 = vmatprep.subr.bf16.mxu1 %v2262_v46 }
 0x260   : > { %1959 = vmatpush3.bf16.msra.mxu1 %v1204_v43 }
 0x261   : > { %1902 = vmatprep.subr.bf16.mxu1 %v2077_v39 }
 0x263   : > { %1961 = vmatmul.mubr.msk.bf16.vlgmr.msra.gmra.mrb[0].mxu1 %vm1224_vm4, %v2076_v52 }
 0x264   : > { %1903 = vmatpush3.bf16.msra.mxu1 %v2926_v53 }
 0x265   : > { %1904 = vmatprep.subr.bf16.mxu1 %v2928_v54 }
 0x268   : > { %1905 = vmatpush3.bf16.msra.mxu1 %v2932_v59 }
 0x269   : > { %1906 = vmatprep.subr.bf16.mxu1 %v2935_v60 }
 0x26c   : > { %1907 = vmatpush3.bf16.msra.mxu1 %v2938_v36 }
 0x26d   : > { %1908 = vmatprep.subr.bf16.mxu1 %v2941_v38 }
 0x270   : > { %1909 = vmatpush3.bf16.msra.mxu1 %v2944_v44 }
 0x271   : > { %1910 = vmatprep.subr.bf16.mxu1 %v2947_v62 }
 0x274   : > { %1911 = vmatpush3.bf16.msra.mxu1 %v2950_v4 }
 0x275   : > { %1912 = vmatprep.subr.bf16.mxu1 %v2953_v5 }
 0x278   : > { %1913 = vmatpush3.bf16.msra.mxu1 %v2956_v6 }
 0x279   : > { %1914 = vmatprep.subr.bf16.mxu1 %v2960_v17 }
 0x27c   : > { %1915 = vmatpush3.bf16.msra.mxu1 %v2962_v18 }
 0x27d   : > { %1916 = vmatprep.subr.bf16.mxu1 %v2966_v28 }
 0x280   : > { %1917 = vmatpush3.bf16.msra.mxu1 %v2970_v35 }
 0x281   : > { %1924 = vmatprep.subr.bf16.mxu1 %v2077_v39 }
 0x2a4   : > { %v1125_v9 = vpop.f32.mrb[0].mxu0 }
 0x2a5   : > { %v1127_v10 = vpop.f32.mrb[1].mxu0  ;;  %v1126_v20 = vadd.f32 %v1125_v9, %v1049_v56 }
 0x2a6   : > { %v1129_v11 = vpop.f32.mrb[2].mxu0  ;;  %v1128_v25 = vadd.f32 %v1127_v10, %v1049_v56 }
 0x2a7   : > { %v1131_v12 = vpop.f32.mrb[3].mxu0  ;;  %v1130_v29 = vadd.f32 %v1129_v11, %v2903_v55 }
 0x2a8   : > { %v1132_v45 = vadd.f32 %v1131_v12, %v2903_v55 }
 0x2ac   : > { %v1135_v19 = vpop.f32.mrb[4].mxu0 }
 0x2ad   : > { %v1136_v21 = vadd.f32 %v1135_v19, %v1059_v57  ;;  %v1137_v22 = vpop.f32.mrb[5].mxu0 }
 0x2ae   : > { %v1138_v26 = vadd.f32 %v1137_v22, %v1059_v57  ;;  %v1139_v27 = vpop.f32.mrb[6].mxu0 }
 0x2af   : > { %v1269_v30 = vmax.f32 %v1126_v20, %v1136_v21  ;;  %v1140_v32 = vadd.f32 %v1139_v27, %v2905_v58  ;;  %v1141_v33 = vpop.f32.mrb[7].mxu0 }
 0x2b0   : > { %v1270_v47 = vmax.f32 %v1128_v25, %v1138_v26  ;;  %v1142_v51 = vadd.f32 %v1141_v33, %v2905_v58 }
 0x2b1   : > { %v1271_v7 = vmax.f32 %v1130_v29, %v1140_v32  ;;  %v1273_v40 = vrot.slane %v1269_v30, 1 }
 0x2b2   : > { %v1272_v8 = vmax.f32 %v1132_v45, %v1142_v51  ;;  %v1274_v41 = vrot.slane %v1270_v47, 1 }
 0x2b3   : > { %v1275_v31 = vrot.slane %v1271_v7, 1 }
 0x2b4   : > { %v1276_v42 = vrot.slane %v1272_v8, 1 }
 0x2b5   : > { %v1282_v49 = vsel %vm1279_vm5, %v1275_v31, %v1273_v40  ;;  %v1280_v50 = vsel %vm1279_vm5, %v1273_v40, %v1275_v31 }
 0x2b6   : > { %v1286_v56 = vmax.f32 %v1271_v7, %v1282_v49  ;;  %v1284_v55 = vmax.f32 %v1269_v30, %v1280_v50  ;;  %v1283_v57 = vsel %vm1279_vm5, %v1276_v42, %v1274_v41  ;;  %v1281_v2 = vsel %vm1279_vm5, %v1274_v41, %v1276_v42 }
 0x2b7   : > { %v1287_v58 = vmax.f32 %v1272_v8, %v1283_v57  ;;  %v1285_v14 = vmax.f32 %v1270_v47, %v1281_v2 }
 0x2b8   : > { %1290 = vrot.lane.b32.xlu1 %v1286_v56, %s3183_s12  ;;  %1288 = vrot.lane.b32.xlu0 %v1284_v55, %s3183_s12 }
 0x2bc   : > { %1294 = vrot.lane.b32.xlu1 %v1287_v58, %s3183_s12  ;;  %1292 = vrot.lane.b32.xlu0 %v1285_v14, %s3183_s12 }
 0x2c0   : > { %1216 = vperm.xlu1 %2069, %v1208_v61   ;;  %1211 = vperm.xlu0 %2068, %v1207_v16  }
 0x2c4   : > { %1624 = vperm.xlu1 %2069, %v1616_v23   ;;  %1619 = vperm.xlu0 %2068, %v1615_v0  }
 0x2c8   : > { %1638 = vperm.xlu1 %2069, %v1630_v3   ;;  %1633 = vperm.xlu0 %2068, %v1629_v15  }
 0x32a   : > { %v1291_v24 = vpop.permute.xlu1 %1290  ;;  %v1289_v37 = vpop.permute.xlu0 %1288 }
 0x32e   : > { %v1295_v39 = vpop.permute.xlu1 %1294  ;;  %v1293_v43 = vpop.permute.xlu0 %1292 }
 0x32f   : > { %v1297_v52 = vsel %vm969_vm2, %v1291_v24, %v1295_v39  ;;  %v1299_v9 = vsel %vm969_vm2, %v1295_v39, %v1291_v24  ;;  %v1296_v10 = vsel %vm969_vm2, %v1289_v37, %v1293_v43  ;;  %v1298_v11 = vsel %vm969_vm2, %v1293_v43, %v1289_v37 }
 0x330   : > { %v1302_v12 = vmax.f32 %v1286_v56, %v1297_v52  ;;  %v1303_v19 = vmax.f32 %v1287_v58, %v1299_v9  ;;  %v1300_v20 = vmax.f32 %v1284_v55, %v1296_v10  ;;  %v1301_v21 = vmax.f32 %v1285_v14, %v1298_v11  ;;  %v1663_v9 = vld [vmem:[%s3188_s13 + $0x8] sm:$0xff]  ;;  %v1662_v10 = vld [vmem:[%s3188_s13] sm:$0xff] }
 0x332   : > { %v1304_v22 = vpack.c.bf16 %v1302_v12, %v1300_v20  ;;  %v1305_v25 = vpack.c.bf16 %v1303_v19, %v1301_v21 }
 0x334   : > { %1476 = vmatprep.mubr.bf16.mxu1 %v1305_v25  ;;  %v1307_v26 = vunpack.c.l.bf16 %v1305_v25  ;;  %v1309_v27 = vunpack.c.h.bf16 %v1305_v25 }
 0x335   : > { %1477 = vmatmul.mubr.bf16.vlgmr.msra.gmra.mrb[4].mxu1 %v1304_v22 }
 0x336   : > { %1925 = vmatpush3.bf16.msra.mxu1 %v2926_v53  ;;  %v1311_v29 = vsub.f32 %v1301_v21, %v1307_v26  ;;  %v1313_v30 = vsub.f32 %v1303_v19, %v1309_v27  ;;  %v1262_v32 = vpop.f32.mrb[0].mxu1  ;;  %v1306_v53 = vunpack.c.l.bf16 %v1304_v22 }
 0x337   : > { %1926 = vmatprep.subr.bf16.mxu1 %v2928_v54  ;;  %v1962_v33 = vpop.f32.mrb[1].mxu1  ;;  %v1308_v54 = vunpack.c.h.bf16 %v1304_v22 }
 0x338   : > { %v1315_v63 = vpack.c.bf16 %v1313_v30, %v1311_v29  ;;  %v1265_v45 = vpop.f32.mrb[2].mxu1 }
 0x339   : > { %v1963_v47 = vpop.f32.mrb[3].mxu1 }
 0x33a   : > { %1927 = vmatpush3.bf16.msra.mxu1 %v2932_v59  ;;  %1519 = vmatprep.mubr.bf16.mxu1 %v1315_v63  ;;  %v1310_v59 = vsub.f32 %v1300_v20, %v1306_v53 }
 0x33b   : > { %1928 = vmatprep.subr.bf16.mxu1 %v2935_v60  ;;  %v1312_v60 = vsub.f32 %v1302_v12, %v1308_v54 }
 0x33e   : > { %1929 = vmatpush3.bf16.msra.mxu1 %v2938_v36  ;;  %v1314_v36 = vpack.c.bf16 %v1312_v60, %v1310_v59 }
 0x33f   : > { %1930 = vmatprep.subr.bf16.mxu1 %v2941_v38  ;;  %v1212_v42 = vpop.permute.xlu0 %1211 }
 0x340   : > { %v1263_v55 = vadd.f32 %v1262_v32, %v1212_v42 }
 0x342   : > { %1931 = vmatpush3.bf16.msra.mxu1 %v2944_v44 }
 0x343   : > { %1932 = vmatprep.subr.bf16.mxu1 %v2947_v62  ;;  %v1620_v50 = vpop.permute.xlu0 %1619 }
 0x346   : > { %1933 = vmatpush3.bf16.msra.mxu1 %v2950_v4 }
 0x347   : > { %1934 = vmatprep.subr.bf16.mxu1 %v2953_v5  ;;  %v1634_v15 = vpop.permute.xlu0 %1633 }
 0x34a   : > { %1935 = vmatpush3.bf16.msra.mxu1 %v2956_v6 }
 0x34b   : > { %1936 = vmatprep.subr.bf16.mxu1 %v2960_v17 }
 0x34e   : > { %1937 = vmatpush3.bf16.msra.mxu1 %v2962_v18 }
 0x34f   : > { %1938 = vmatprep.subr.bf16.mxu1 %v2966_v28  ;;  %v1485_v28 = vld [vmem:[%s3186_s19] sm:$0xf]  ;;  %s691_s19 = scalar_lea.vmem [#allocation8], %s3190_s26 }
 0x352   : > { %1939 = vmatpush3.bf16.msra.mxu1 %v2970_v35  ;;  %v1217_v35 = vpop.permute.xlu1 %1216 }
 0x353   : > { %v1266_v56 = vadd.f32 %v1265_v45, %v1217_v35 }
 0x355   : > { %1520 = vmatmul.mubr.bf16.vlgmr.msra.gmra.mrb[8].mxu1 %v1314_v36 }
 0x356   : > { %v1625_v49 = vpop.permute.xlu1 %1624 }
 0x35a   : > { %v1639_v3 = vpop.permute.xlu1 %1638 }
 0x408   : > { %v1918_v38 = vpop.f32.mrb[4].mxu1 }
 0x409   : > { %v1919_v44 = vpop.f32.mrb[5].mxu1 }
 0x40a   : > { %v1920_v62 = vadd.f32 %v1919_v44, %v1918_v38  ;;  %v1921_v4 = vpop.f32.mrb[6].mxu1 }
 0x40b   : > { %v1922_v5 = vpop.f32.mrb[7].mxu1 }
 0x40c   : > { %v1923_v6 = vadd.f32 %v1922_v5, %v1921_v4 }
 0x40e   : > { %v1486_v51 = vpack.c.bf16 %v1923_v6, %v1920_v62 }
 0x428   : > { %v1940_v7 = vpop.f32.mrb[8].mxu1 }
 0x429   : > { %v1941_v8 = vpop.f32.mrb[9].mxu1 }
 0x42a   : > { %v1942_v17 = vadd.f32 %v1941_v8, %v1940_v7  ;;  %v1943_v40 = vpop.f32.mrb[10].mxu1 }
 0x42b   : > { %v1944_v18 = vpop.f32.mrb[11].mxu1 }
 0x42c   : > { %v1945_v31 = vadd.f32 %v1944_v18, %v1943_v40 }
 0x42e   : > { %v1528_v41 = vpack.c.bf16 %v1945_v31, %v1942_v17 }
 0x430   : > { %1965 = vmatpush3.bf16.msra.mxu0 %v1528_v41 }
 0x431   : > { %1970 = vmatprep.subr.bf16.mxu0 %v2262_v46 }
 0x433   : > { %1967 = vmatmul.mubr.msk.bf16.vlgmr.msra.gmra.mrb[8].mxu0 %vm1529_vm6, %v1485_v28 }
 0x434   : > { %1971 = vmatpush3.bf16.msra.mxu0 %v1486_v51  ;;  %1972 = vmatprep.mubr.msk.bf16.mxu0 %vm2263_vm3, %v2262_v46 }
 0x435   : > { %1976 = vmatprep.subr.bf16.mxu0 %v2262_v46 }
 0x43f   : > { %1973 = vmatmul.mubr.msk.bf16.vlgmr.msra.gmra.mrb[8].mxu0 %vm1529_vm6, %v1485_v28 }
 0x440   : > { %1982 = vmatprep.mubr.msk.bf16.mxu0 %vm2263_vm3, %v2262_v46 }
 0x512   : > { %v1607_v57 = vpop.f32.mrb[8].mxu0 }
 0x513   : > { %v1613_v2 = vadd.f32 %v1607_v57, %v1263_v55  ;;  %v1614_v58 = vadd.f32 %v1607_v57, %v1266_v56  ;;  %v1974_v14 = vpop.f32.mrb[9].mxu0 }
 0x514   : > { %v1610_v61 = vpop.f32.mrb[10].mxu0 }
 0x515   : > { %v1627_v16 = vmul.f32 %v1620_v50, %v1613_v2  ;;  %v1628_v23 = vmul.f32 %v1625_v49, %v1614_v58  ;;  %v1975_v0 = vpop.f32.mrb[11].mxu0 }
 0x517   : > { %v1642_v24 = vadd.f32 %v1639_v3, %v1628_v23  ;;  %v1641_v37 = vadd.f32 %v1634_v15, %v1627_v16 }
 0x519   : > { %v1644_v39 = vmax.f32 %v1642_v24, 0.0  ;;  %v1643_v43 = vmax.f32 %v1641_v37, 0.0 }
 0x51b   : > { %1647 = vrot.lane.b32.xlu1 %v1644_v39, %s3187_s10  ;;  %1645 = vrot.lane.b32.xlu0 %v1643_v43, %s3187_s10  ;;  %v1658_v52 = vpack.c.bf16 %v1644_v39, %v1643_v43  ;;  %s1741_s10 = sshll.u32 %s691_s19, 4  ;;  %s3055_s10 = int_to_ptr.vmem [resolvable:$true] %s1741_s10 }
 0x51c   : > { %s2180_s3 = scalar_lea.vmem %s3055_s10, 256 }
 0x51d   : > { %p2181_p0 = scmp.ne.s32.totalorder %s3055_s10, %s2180_s3 }
 0x51f   : > { %1653 = vrot.lane.b32.xlu1 %v1644_v39, %s3183_s12  ;;  %1651 = vrot.lane.b32.xlu0 %v1643_v43, %s3183_s12  ;;  %s3060_s12 = scalar_lea.hbm %s3191_s0, %s1897_s18  ;;  %p2182_p3 = pnand %p2181_p0, %p3192_p2 }
 0x521   : > { %p2183_p5 = pneg %p2182_p3 }
 0x523   : > { %1671 = vperm.xlu1 %2069, %v1663_v9   ;;  %1666 = vperm.xlu0 %2068, %v1662_v10  }
 0x58d   : > { %v1648_v11 = vpop.permute.xlu1 %1647  ;;  %v1646_v12 = vpop.permute.xlu0 %1645 }
 0x58e   : > { %v1650_v19 = vmul.f32 %v2910_v1, %v1648_v11  ;;  %v1649_v20 = vmul.f32 %v2910_v1, %v1646_v12  ;;  %v2093_v1 = vld [vmem:[%s3189_s5] sm:$0xff]   ;;  %s2264_s5 = smov [#allocation8]  }
 0x58f   : > { %s2184_s26 = sshll.u32 %s2264_s5, 4  ;;  %s2185_s26 = int_to_ptr.vmem [resolvable:$false] %s2184_s26 }
 0x590   : > { %v1657_v21 = vpack.c.bf16 %v1650_v19, %v1649_v20  ;;  %s2186_s4 = scalar_lea.vmem %s2185_s26, 512  ;;  %p2187_p9 = scmp.lt.s32.totalorder %s3055_s10, %s2185_s26 }
 0x591   : > { %v1654_v22 = vpop.permute.xlu1 %1653  ;;  %v1652_v25 = vpop.permute.xlu0 %1651  ;;  %p2188_p12 = scmp.lt.s32.totalorder %s2186_s4, %s2180_s3 }
 0x592   : > { %1977 = vmatpush3.bf16.msra.mxu0 %v1657_v21  ;;  %v1656_v26 = vmul.f32 %v2917_v13, %v1654_v22  ;;  %v1655_v27 = vmul.f32 %v2917_v13, %v1652_v25 }
 0x593   : > { %1978 = vmatprep.subr.bf16.mxu0 %v2262_v46  ;;  %p2189_p1 = por %p2188_p12, %p2187_p9 }
 0x594   : > { %v1659_v29 = vpack.c.bf16 %v1656_v26, %v1655_v27 }
 0x595   : > { %p2190_p13 = pnand %p2189_p1, %p2183_p5 }
 0x596   : > { %1979 = vmatpush3.bf16.msra.mxu0 %v1658_v52 }
 0x597   : > { %1980 = vmatprep.subr.bf16.mxu0 %v2262_v46 }
 0x59a   : > { %1981 = vmatpush3.bf16.msra.mxu0 %v1659_v29 }
 0x59d   : > { %1983 = vmatmul.mubr.msk.bf16.vlgmr.msra.gmra.mrb[12].mxu0 %vm1224_vm4, %v2093_v1 }
 0x5a2   : > { %v1667_v30 = vpop.permute.xlu0 %1666  ;;  %v1672_v63 = vpop.permute.xlu1 %1671 }
 0x670   : > { %v1716_v32 = vpop.f32.mrb[12].mxu0 }
 0x671   : > { %v1717_v33 = vadd.f32 %v1716_v32, %v1667_v30  ;;  %v1984_v13 = vpop.f32.mrb[13].mxu0 }
 0x672   : > { %v1719_v46 = vpop.f32.mrb[14].mxu0 }
 0x673   : > { %v1723_v45 = vmul.f32 %v1717_v33, %v2886_v34  ;;  %v1720_v47 = vadd.f32 %v1719_v46, %v1672_v63  ;;  %v1985_v53 = vpop.f32.mrb[15].mxu0 }
 0x675   : > { %1725 = vst [vmem:[%s691_s19] sm:$0xff] %v1723_v45  ;;  %v1724_v54 = vmul.f32 %v1720_v47, %v2892_v48 }
 0x677   : > { %1726 = vst [vmem:[%s691_s19 + $0x8] sm:$0xff] %v1724_v54 }
 0x678   : > { %2193 = shalt.err (!%p2190_p13)
}
 0x679   : > { %s2194_s19 = scalar_lea.hbm %s3060_s12, 256  ;;  %s2198_s25 = scalar_lea.hbm %s3191_s0, 512 }
 0x67a   : > { %p2195_p6 = scmp.ne.s32.totalorder %s3060_s12, %s2194_s19  ;;  %p2199_p7 = scmp.lt.u32.totalorder %s3060_s12, %s3191_s0 }
 0x67b   : > { %p2200_p8 = scmp.lt.u32.totalorder %s2198_s25, %s2194_s19  ;;  %p2202_p0 = scmp.lt.u32.totalorder %s2194_s19, %s3060_s12 }
 0x67c   : > { %p2196_p10 = pnand %p2195_p6, %p3192_p2 }
 0x67d   : > { %p2201_p11 = por %p2200_p8, %p2199_p7 }
 0x67e   : > { %p2197_p4 = pneg %p2196_p10 }
 0x67f   : > { %p2203_p3 = por %p2202_p0, %p2201_p11 }
 0x681   : > { %p2204_p5 = pnand %p2203_p3, %p2197_p4 }
 0x683   : > { %2207 = shalt.err (!%p2204_p5)
}
 0x684   : > { %s2265_s4 = smov 128   ;;  %s2266_s3 = smov 8  }
 0x685   : > { %2000 = dma.vmem_to_hbm [thread:$0]  (%p3192_p2), %s3055_s10, 256, %s3060_s12, %s1728_s2, %s2265_s4, %s2265_s4, %s2266_s3  }
 0x686 PF: > { %s3193_s18 = sld [smem:[#allocation12_spill]]  ;;  %s3194_s29 = sld [smem:[#allocation13_spill]] }
 0x687   : > { %p3196_p12 = scmp.ge.s32.totalorder %s2250_s24, 2 }
 0x68c   : > { %s1756_s5 = sand.u32 1, %s3193_s18   ;;  %p3195_p9 = scmp.ne.s32.totalorder %s3194_s29, 0 }
 0x68d   : > { %s1757_s19 = scalar_lea.sflag [#allocation4], %s1756_s5 }
 0x68e   : > { %p2014_p1 = pnand %p3196_p12, %p3195_p9 }
 0x690   : > { %2233 = dma.done.wait (!%p2014_p1), %s1757_s19, 256  }
 0x691   : > { %2235 = vsyncadd (!%p2014_p1), %s1757_s19, 4294967040  ;;  %s3197_s25 = smov %s2485_s1  ;;  %p34_p13 = scmp.ge.s32.totalorder %s2485_s1, 4  }
 0x692   : > { %s3198_s1 = smov %s2242_s22  ;;  %s3199_s22 = smov %s2246_s23 }
 0x693   : > { %s3200_s23 = smov %s2494_s28  ;;  %s3201_s24 = smov %s3197_s25 }
 0x694   :  { %36 = sbr.rel (!%p34_p13) target bundleno = 20 (0x14), region = 156 }
 0x69b   :  { %1762 = vsyncpa [#allocation3], 1 }
 0x69c   :  { %1764 = vsyncpa [#allocation3 + $0x1], 1 }
 0x69d   :  { %1765 = vsyncpa [#allocation6], 1 }
 0x69e   :  { %1766 = vsyncpa [#allocation4], 1 }
 0x69f   :  { %1768 = vsyncpa [#allocation4 + $0x1], 1 }

</bundles_post_ra>
